<compile_context>
chip_gen: v6e
topology: v6e:2x2x1
jax: 0.10.0
libtpu: 0.0.40
codegen_flags: <defaults>
</compile_context>

<pallas_src>
import math

import jax
import jax.numpy as jnp
from jax.experimental import pallas as pl
from jax.experimental.pallas import tpu as pltpu

# ----------------------------- tiny GPT config ------------------------------
VOCAB = 128
N_POS = 16
HIDDEN = 32
N_HEAD = 2
HEAD_DIM = HIDDEN // N_HEAD
N_LAYER = 2
FF = 4 * HIDDEN
CLASS_NUM = 2
LN_EPS = 1e-5


# ------------------------------ kernel helpers -------------------------------
def _layernorm(x, g, b):
    mu = jnp.mean(x, axis=-1, keepdims=True)
    var = jnp.mean((x - mu) ** 2, axis=-1, keepdims=True)
    return (x - mu) * jax.lax.rsqrt(var + LN_EPS) * g + b


def _gelu_new(x):
    # GPT-2 "new" GELU (tanh approximation), matches HF NewGELUActivation.
    return 0.5 * x * (1.0 + jnp.tanh(math.sqrt(2.0 / math.pi) * (x + 0.044715 * x * x * x)))


# -------------------- fully fused GPT-2 + classifier kernel ------------------
def gpt_cls_kernel(x_ref, bias_ref,
                   w_qkv_ref, w_o_ref, w_fc_ref, w_pr_ref,
                   ln_gb_ref, b_qkv_ref, b_op_ref, b_fc_ref,
                   lnf_gb_ref, w_out_ref, b_out_ref,
                   out_ref):
    BS, _ = x_ref.shape
    B, S, _ = bias_ref.shape
    scale = 1.0 / math.sqrt(HEAD_DIM)

    x = x_ref[...]                                        # (B*S, H) residual stream

    for l in range(N_LAYER):
        lnp = ln_gb_ref[l]                                # (4, H): ln1_g, ln1_b, ln2_g, ln2_b
        bqkv = b_qkv_ref[l]                               # (3*N_HEAD, HEAD_DIM)
        bop = b_op_ref[l]                                 # (2, H): attn-out bias, mlp-out bias

        # ---------------- attention sub-block ----------------
        h = _layernorm(x, lnp[0:1, :], lnp[1:2, :])       # whole batch at once

        attn = None
        for hh in range(N_HEAD):
            base = l * 3 * N_HEAD
            wq = w_qkv_ref[base + 0 * N_HEAD + hh]        # (H, HEAD_DIM), lane offset 0
            wk = w_qkv_ref[base + 1 * N_HEAD + hh]
            wv = w_qkv_ref[base + 2 * N_HEAD + hh]
            q = (jnp.dot(h, wq, preferred_element_type=jnp.float32)
                 + bqkv[hh:hh + 1, :])
            k = (jnp.dot(h, wk, preferred_element_type=jnp.float32)
                 + bqkv[N_HEAD + hh:N_HEAD + hh + 1, :])
            v = (jnp.dot(h, wv, preferred_element_type=jnp.float32)
                 + bqkv[2 * N_HEAD + hh:2 * N_HEAD + hh + 1, :])

            # score / softmax / AV per batch element (sublane-aligned row slices)
            oh_b = []
            for b in range(B):
                r0 = b * S
                qb, kb, vb = q[r0:r0 + S, :], k[r0:r0 + S, :], v[r0:r0 + S, :]
                sc = jax.lax.dot_general(qb, kb, (((1,), (1,)), ((), ())),
                                         preferred_element_type=jnp.float32)
                sc = sc * scale + bias_ref[b]
                mx = jnp.max(sc, axis=-1, keepdims=True)
                p = jnp.exp(sc - mx)
                p = p * pl.reciprocal(jnp.sum(p, axis=-1, keepdims=True), approx=True)
                oh_b.append(jnp.dot(p, vb, preferred_element_type=jnp.float32))  # (S, HD)
            oh = jnp.concatenate(oh_b, axis=0)            # (B*S, HEAD_DIM)

            # concat(heads) @ Wo  ==  sum_h head_h @ Wo[h]
            proj = jnp.dot(oh, w_o_ref[l * N_HEAD + hh],
                           preferred_element_type=jnp.float32)           # (B*S, H)
            attn = proj if attn is None else attn + proj

        x = x + attn + bop[0:1, :]

        # ---------------- MLP sub-block ----------------
        h2 = _layernorm(x, lnp[2:3, :], lnp[3:4, :])
        a = _gelu_new(jnp.dot(h2, w_fc_ref[l], preferred_element_type=jnp.float32)
                      + b_fc_ref[l])
        m = jnp.dot(a, w_pr_ref[l], preferred_element_type=jnp.float32) + bop[1:2, :]
        x = x + m

    # -------------- final LN + last-token classifier --------------
    lnf = lnf_gb_ref[...]                                 # (2, H): lnf_g, lnf_b
    xl = jnp.concatenate([x[b * S + S - 1:b * S + S, :] for b in range(B)], axis=0)  # (B, H)
    hcls = _layernorm(xl, lnf[0:1, :], lnf[1:2, :])
    out_ref[...] = (jnp.dot(hcls, w_out_ref[...], preferred_element_type=jnp.float32)
                    + b_out_ref[...])


# --------------------------------- wrapper -----------------------------------
def _vmem_spec():
    return pl.BlockSpec(memory_space=pltpu.MemorySpace.VMEM)


def pack_params(params):
    """Repack standard GPT-2-style params into the stacked / head-split kernel layout."""
    def split_qkv(w):   # (H, 3H) -> (3*N_HEAD, H, HEAD_DIM): q heads, k heads, v heads
        parts = []
        for i in range(3):
            wi = w[:, i * HIDDEN:(i + 1) * HIDDEN]
            for hh in range(N_HEAD):
                parts.append(wi[:, hh * HEAD_DIM:(hh + 1) * HEAD_DIM])
        return jnp.stack(parts)

    def split_bqkv(b):  # (1, 3H) -> (3*N_HEAD, HEAD_DIM)
        b = b.reshape(3 * HIDDEN)
        parts = []
        for i in range(3):
            bi = b[i * HIDDEN:(i + 1) * HIDDEN]
            for hh in range(N_HEAD):
                parts.append(bi[hh * HEAD_DIM:(hh + 1) * HEAD_DIM])
        return jnp.stack(parts)

    def split_wo(w):    # (H, H) -> (N_HEAD, HEAD_DIM, H)
        return jnp.stack([w[hh * HEAD_DIM:(hh + 1) * HEAD_DIM, :] for hh in range(N_HEAD)])

    blocks = params["blocks"]
    return {
        "wte": params["wte"],
        "wpe": params["wpe"],
        "w_qkv": jnp.concatenate([split_qkv(b["wqkv"]) for b in blocks], axis=0),  # (L*3*NH, H, HD)
        "w_o": jnp.concatenate([split_wo(b["wo"]) for b in blocks], axis=0),       # (L*NH, HD, H)
        "w_fc": jnp.stack([b["wfc"] for b in blocks]),                             # (L, H, FF)
        "w_pr": jnp.stack([b["wpr"] for b in blocks]),                             # (L, FF, H)
        "ln_gb": jnp.stack([jnp.concatenate(
            [b["ln1_g"], b["ln1_b"], b["ln2_g"], b["ln2_b"]], axis=0)
            for b in blocks]),                                                     # (L, 4, H)
        "b_qkv": jnp.stack([split_bqkv(b["bqkv"]) for b in blocks]),               # (L, 3*NH, HD)
        "b_op": jnp.stack([jnp.concatenate([b["bo"], b["bpr"]], axis=0)
                           for b in blocks]),                                      # (L, 2, H)
        "b_fc": jnp.stack([b["bfc"] for b in blocks]),                             # (L, 1, FF)
        "lnf_gb": jnp.concatenate([params["lnf_g"], params["lnf_b"]], axis=0),     # (2, H)
        "w_out": params["wout"],
        "b_out": params["bout"],
    }


@jax.jit
def gpt_for_cls(input_ids, attention_mask, p):
    B, S = input_ids.shape

    # TODO(synk): token/position embedding gather stays in plain JAX (data-dependent
    # row gather; no cheap BlockSpec form worth it at this size).
    pos = jnp.arange(S)
    x = p["wte"][input_ids] + p["wpe"][pos][None, :, :]          # (B, S, H)
    x2d = x.reshape(B * S, HIDDEN).astype(jnp.float32)           # batch folded onto sublanes

    # Additive attention bias: causal + key padding mask (glue).
    causal = jnp.tril(jnp.ones((S, S), jnp.float32))
    keymask = attention_mask.astype(jnp.float32)[:, None, :]     # (B, 1, S)
    allow = causal[None, :, :] * keymask                         # (B, S, S)
    bias = (1.0 - allow) * jnp.float32(-1e9)

    # TODO(synk): for non-toy HIDDEN/FF, cast matmul operands to bf16 (v6e/v7x MXU)
    # and budget tiles against v7x's 64 MiB VMEM; irrelevant at this size.
    preds = pl.pallas_call(
        gpt_cls_kernel,
        out_shape=jax.ShapeDtypeStruct((B, CLASS_NUM), jnp.float32),
        in_specs=[_vmem_spec()] * 13,
        out_specs=_vmem_spec(),
    )(x2d, bias,
      p["w_qkv"], p["w_o"], p["w_fc"], p["w_pr"],
      p["ln_gb"], p["b_qkv"], p["b_op"], p["b_fc"],
      p["lnf_gb"], p["w_out"], p["b_out"])
    return preds


# ----------------------- deterministic parameter init ------------------------
def init_params(key):
    def nrm(k, shape):
        return 0.02 * jax.random.normal(k, shape, jnp.float32)

    keys = iter(jax.random.split(key, 4 + 4 * N_LAYER))
    params = {
        "wte": nrm(next(keys), (VOCAB, HIDDEN)),
        "wpe": nrm(next(keys), (N_POS, HIDDEN)),
        "lnf_g": jnp.ones((1, HIDDEN), jnp.float32),
        "lnf_b": jnp.zeros((1, HIDDEN), jnp.float32),
        "wout": nrm(next(keys), (HIDDEN, CLASS_NUM)),
        "bout": jnp.zeros((1, CLASS_NUM), jnp.float32),
        "blocks": [],
    }
    for _ in range(N_LAYER):
        params["blocks"].append({
            "ln1_g": jnp.ones((1, HIDDEN), jnp.float32),
            "ln1_b": jnp.zeros((1, HIDDEN), jnp.float32),
            "wqkv": nrm(next(keys), (HIDDEN, 3 * HIDDEN)),
            "bqkv": jnp.zeros((1, 3 * HIDDEN), jnp.float32),
            "wo": nrm(next(keys), (HIDDEN, HIDDEN)),
            "bo": jnp.zeros((1, HIDDEN), jnp.float32),
            "ln2_g": jnp.ones((1, HIDDEN), jnp.float32),
            "ln2_b": jnp.zeros((1, HIDDEN), jnp.float32),
            "wfc": nrm(next(keys), (HIDDEN, FF)),
            "bfc": jnp.zeros((1, FF), jnp.float32),
            "wpr": nrm(next(keys), (FF, HIDDEN)),
            "bpr": jnp.zeros((1, HIDDEN), jnp.float32),
        })
    # remaining split keys (if any) intentionally unused
    return params


# ----------------------------------- main ------------------------------------
if __name__ == "__main__":
    B, S = 2, 8
    root = jax.random.PRNGKey(0)
    k_ids, k_params = jax.random.split(root)

    input_ids = jax.random.randint(k_ids, (B, S), 0, VOCAB, dtype=jnp.int32)
    # second example has 2 padded (masked-out) trailing tokens
    attention_mask = jnp.array([[1, 1, 1, 1, 1, 1, 1, 1],
                                [1, 1, 1, 1, 1, 1, 0, 0]], dtype=jnp.int32)

    params = init_params(k_params)
    packed = pack_params(params)        # one-time host-side repack into kernel layout
    preds = gpt_for_cls(input_ids, attention_mask, packed)
    jax.block_until_ready(preds)
    assert preds.shape == (B, CLASS_NUM) and preds.dtype == jnp.float32
    print("KERNEL_OK")
</pallas_src>

<mosaic_0001>
module attributes {stable_mosaic.version = 11 : i64} {
  func.func @gpt_cls_kernel(%arg0: memref<16x32xf32, #tpu.memory_space<vmem>>, %arg1: memref<2x8x8xf32, #tpu.memory_space<vmem>>, %arg2: memref<12x32x16xf32, #tpu.memory_space<vmem>>, %arg3: memref<4x16x32xf32, #tpu.memory_space<vmem>>, %arg4: memref<2x32x128xf32, #tpu.memory_space<vmem>>, %arg5: memref<2x128x32xf32, #tpu.memory_space<vmem>>, %arg6: memref<2x4x32xf32, #tpu.memory_space<vmem>>, %arg7: memref<2x6x16xf32, #tpu.memory_space<vmem>>, %arg8: memref<2x2x32xf32, #tpu.memory_space<vmem>>, %arg9: memref<2x1x128xf32, #tpu.memory_space<vmem>>, %arg10: memref<2x32xf32, #tpu.memory_space<vmem>>, %arg11: memref<32x2xf32, #tpu.memory_space<vmem>>, %arg12: memref<1x2xf32, #tpu.memory_space<vmem>>, %arg13: memref<2x2xf32, #tpu.memory_space<vmem>>) attributes {dimension_semantics = [], scalar_prefetch = 0 : i64, scratch_operands = 0 : i64, tpu.core_type = #tpu.core_type<tc>} {
    %c0 = arith.constant 0 : index
    %c0_0 = arith.constant 0 : index
    %0 = vector.load %arg0[%c0, %c0_0] : memref<16x32xf32, #tpu.memory_space<vmem>>, vector<16x32xf32>
    %c0_1 = arith.constant 0 : index
    %c0_2 = arith.constant 0 : index
    %c0_3 = arith.constant 0 : index
    %1 = vector.load %arg6[%c0_1, %c0_2, %c0_3] : memref<2x4x32xf32, #tpu.memory_space<vmem>>, vector<1x4x32xf32>
    %2 = vector.shape_cast %1 : vector<1x4x32xf32> to vector<4x32xf32>
    %c0_4 = arith.constant 0 : index
    %c0_5 = arith.constant 0 : index
    %c0_6 = arith.constant 0 : index
    %3 = vector.load %arg7[%c0_4, %c0_5, %c0_6] : memref<2x6x16xf32, #tpu.memory_space<vmem>>, vector<1x6x16xf32>
    %4 = vector.shape_cast %3 : vector<1x6x16xf32> to vector<6x16xf32>
    %c0_7 = arith.constant 0 : index
    %c0_8 = arith.constant 0 : index
    %c0_9 = arith.constant 0 : index
    %5 = vector.load %arg8[%c0_7, %c0_8, %c0_9] : memref<2x2x32xf32, #tpu.memory_space<vmem>>, vector<1x2x32xf32>
    %6 = vector.shape_cast %5 : vector<1x2x32xf32> to vector<2x32xf32>
    %7 = vector.extract_strided_slice %2 {offsets = [0, 0], sizes = [1, 32], strides = [1, 1]} : vector<4x32xf32> to vector<1x32xf32>
    %8 = vector.extract_strided_slice %2 {offsets = [1, 0], sizes = [1, 32], strides = [1, 1]} : vector<4x32xf32> to vector<1x32xf32>
    %cst = arith.constant dense<0.000000e+00> : vector<16xf32>
    %9 = vector.multi_reduction <add>, %0, %cst [1] : vector<16x32xf32> to vector<16xf32>
    %10 = vector.shape_cast %9 : vector<16xf32> to vector<16x1xf32>
    %cst_10 = arith.constant 3.200000e+01 : f32
    %11 = vector.broadcast %cst_10 : f32 to vector<16x1xf32>
    %12 = arith.divf %10, %11 : vector<16x1xf32>
    %13 = vector.broadcast %12 : vector<16x1xf32> to vector<16x32xf32>
    %14 = arith.subf %0, %13 : vector<16x32xf32>
    %15 = arith.mulf %14, %14 : vector<16x32xf32>
    %cst_11 = arith.constant dense<0.000000e+00> : vector<16xf32>
    %16 = vector.multi_reduction <add>, %15, %cst_11 [1] : vector<16x32xf32> to vector<16xf32>
    %17 = vector.shape_cast %16 : vector<16xf32> to vector<16x1xf32>
    %cst_12 = arith.constant 3.200000e+01 : f32
    %18 = vector.broadcast %cst_12 : f32 to vector<16x1xf32>
    %19 = arith.divf %17, %18 : vector<16x1xf32>
    %20 = vector.broadcast %12 : vector<16x1xf32> to vector<16x32xf32>
    %21 = arith.subf %0, %20 : vector<16x32xf32>
    %cst_13 = arith.constant 9.99999974E-6 : f32
    %22 = vector.broadcast %cst_13 : f32 to vector<16x1xf32>
    %23 = arith.addf %19, %22 : vector<16x1xf32>
    %24 = math.rsqrt %23 : vector<16x1xf32>
    %25 = vector.broadcast %24 : vector<16x1xf32> to vector<16x32xf32>
    %26 = arith.mulf %21, %25 : vector<16x32xf32>
    %27 = vector.broadcast %7 : vector<1x32xf32> to vector<16x32xf32>
    %28 = arith.mulf %26, %27 : vector<16x32xf32>
    %29 = vector.broadcast %8 : vector<1x32xf32> to vector<16x32xf32>
    %30 = arith.addf %28, %29 : vector<16x32xf32>
    %c0_14 = arith.constant 0 : index
    %c0_15 = arith.constant 0 : index
    %c0_16 = arith.constant 0 : index
    %31 = vector.load %arg2[%c0_14, %c0_15, %c0_16] : memref<12x32x16xf32, #tpu.memory_space<vmem>>, vector<1x32x16xf32>
    %32 = vector.shape_cast %31 : vector<1x32x16xf32> to vector<32x16xf32>
    %c2 = arith.constant 2 : index
    %c0_17 = arith.constant 0 : index
    %c0_18 = arith.constant 0 : index
    %33 = vector.load %arg2[%c2, %c0_17, %c0_18] : memref<12x32x16xf32, #tpu.memory_space<vmem>>, vector<1x32x16xf32>
    %34 = vector.shape_cast %33 : vector<1x32x16xf32> to vector<32x16xf32>
    %c4 = arith.constant 4 : index
    %c0_19 = arith.constant 0 : index
    %c0_20 = arith.constant 0 : index
    %35 = vector.load %arg2[%c4, %c0_19, %c0_20] : memref<12x32x16xf32, #tpu.memory_space<vmem>>, vector<1x32x16xf32>
    %36 = vector.shape_cast %35 : vector<1x32x16xf32> to vector<32x16xf32>
    %cst_21 = arith.constant dense<0.000000e+00> : vector<16x16xf32>
    %37 = tpu.matmul %30, %32, %cst_21 {dimension_numbers = #tpu.dot_dimension_numbers<[1], [0], [0], [1], [0, 0, 1, 1], [], []>} : vector<16x32xf32>, vector<32x16xf32>, vector<16x16xf32> -> vector<16x16xf32>
    %38 = vector.extract_strided_slice %4 {offsets = [0, 0], sizes = [1, 16], strides = [1, 1]} : vector<6x16xf32> to vector<1x16xf32>
    %39 = vector.broadcast %38 : vector<1x16xf32> to vector<16x16xf32>
    %40 = arith.addf %37, %39 : vector<16x16xf32>
    %cst_22 = arith.constant dense<0.000000e+00> : vector<16x16xf32>
    %41 = tpu.matmul %30, %34, %cst_22 {dimension_numbers = #tpu.dot_dimension_numbers<[1], [0], [0], [1], [0, 0, 1, 1], [], []>} : vector<16x32xf32>, vector<32x16xf32>, vector<16x16xf32> -> vector<16x16xf32>
    %42 = vector.extract_strided_slice %4 {offsets = [2, 0], sizes = [1, 16], strides = [1, 1]} : vector<6x16xf32> to vector<1x16xf32>
    %43 = vector.broadcast %42 : vector<1x16xf32> to vector<16x16xf32>
    %44 = arith.addf %41, %43 : vector<16x16xf32>
    %cst_23 = arith.constant dense<0.000000e+00> : vector<16x16xf32>
    %45 = tpu.matmul %30, %36, %cst_23 {dimension_numbers = #tpu.dot_dimension_numbers<[1], [0], [0], [1], [0, 0, 1, 1], [], []>} : vector<16x32xf32>, vector<32x16xf32>, vector<16x16xf32> -> vector<16x16xf32>
    %46 = vector.extract_strided_slice %4 {offsets = [4, 0], sizes = [1, 16], strides = [1, 1]} : vector<6x16xf32> to vector<1x16xf32>
    %47 = vector.broadcast %46 : vector<1x16xf32> to vector<16x16xf32>
    %48 = arith.addf %45, %47 : vector<16x16xf32>
    %49 = vector.extract_strided_slice %40 {offsets = [0, 0], sizes = [8, 16], strides = [1, 1]} : vector<16x16xf32> to vector<8x16xf32>
    %50 = vector.extract_strided_slice %44 {offsets = [0, 0], sizes = [8, 16], strides = [1, 1]} : vector<16x16xf32> to vector<8x16xf32>
    %51 = vector.extract_strided_slice %48 {offsets = [0, 0], sizes = [8, 16], strides = [1, 1]} : vector<16x16xf32> to vector<8x16xf32>
    %cst_24 = arith.constant dense<0.000000e+00> : vector<8x8xf32>
    %52 = tpu.matmul %49, %50, %cst_24 {dimension_numbers = #tpu.dot_dimension_numbers<[1], [1], [0], [0], [0, 0, 1, 0], [], []>} : vector<8x16xf32>, vector<8x16xf32>, vector<8x8xf32> -> vector<8x8xf32>
    %cst_25 = arith.constant 2.500000e-01 : f32
    %53 = vector.broadcast %cst_25 : f32 to vector<8x8xf32>
    %54 = arith.mulf %52, %53 : vector<8x8xf32>
    %c0_26 = arith.constant 0 : index
    %c0_27 = arith.constant 0 : index
    %c0_28 = arith.constant 0 : index
    %55 = vector.load %arg1[%c0_26, %c0_27, %c0_28] : memref<2x8x8xf32, #tpu.memory_space<vmem>>, vector<1x8x8xf32>
    %56 = vector.shape_cast %55 : vector<1x8x8xf32> to vector<8x8xf32>
    %57 = arith.addf %54, %56 : vector<8x8xf32>
    %cst_29 = arith.constant dense<0xFF800000> : vector<8xf32>
    %58 = vector.multi_reduction <maximumf>, %57, %cst_29 [1] : vector<8x8xf32> to vector<8xf32>
    %59 = vector.shape_cast %58 : vector<8xf32> to vector<8x1xf32>
    %60 = vector.broadcast %59 : vector<8x1xf32> to vector<8x8xf32>
    %61 = arith.subf %57, %60 : vector<8x8xf32>
    %62 = math.exp %61 : vector<8x8xf32>
    %cst_30 = arith.constant dense<0.000000e+00> : vector<8xf32>
    %63 = vector.multi_reduction <add>, %62, %cst_30 [1] : vector<8x8xf32> to vector<8xf32>
    %64 = vector.shape_cast %63 : vector<8xf32> to vector<8x1xf32>
    %65 = tpu.reciprocal %64 {approx = true} : vector<8x1xf32> -> vector<8x1xf32>
    %66 = vector.broadcast %65 : vector<8x1xf32> to vector<8x8xf32>
    %67 = arith.mulf %62, %66 : vector<8x8xf32>
    %cst_31 = arith.constant dense<0.000000e+00> : vector<8x16xf32>
    %68 = tpu.matmul %67, %51, %cst_31 {dimension_numbers = #tpu.dot_dimension_numbers<[1], [0], [0], [1], [0, 0, 1, 1], [], []>} : vector<8x8xf32>, vector<8x16xf32>, vector<8x16xf32> -> vector<8x16xf32>
    %69 = vector.extract_strided_slice %40 {offsets = [8, 0], sizes = [8, 16], strides = [1, 1]} : vector<16x16xf32> to vector<8x16xf32>
    %70 = vector.extract_strided_slice %44 {offsets = [8, 0], sizes = [8, 16], strides = [1, 1]} : vector<16x16xf32> to vector<8x16xf32>
    %71 = vector.extract_strided_slice %48 {offsets = [8, 0], sizes = [8, 16], strides = [1, 1]} : vector<16x16xf32> to vector<8x16xf32>
    %cst_32 = arith.constant dense<0.000000e+00> : vector<8x8xf32>
    %72 = tpu.matmul %69, %70, %cst_32 {dimension_numbers = #tpu.dot_dimension_numbers<[1], [1], [0], [0], [0, 0, 1, 0], [], []>} : vector<8x16xf32>, vector<8x16xf32>, vector<8x8xf32> -> vector<8x8xf32>
    %cst_33 = arith.constant 2.500000e-01 : f32
    %73 = vector.broadcast %cst_33 : f32 to vector<8x8xf32>
    %74 = arith.mulf %72, %73 : vector<8x8xf32>
    %c1 = arith.constant 1 : index
    %c0_34 = arith.constant 0 : index
    %c0_35 = arith.constant 0 : index
    %75 = vector.load %arg1[%c1, %c0_34, %c0_35] : memref<2x8x8xf32, #tpu.memory_space<vmem>>, vector<1x8x8xf32>
    %76 = vector.shape_cast %75 : vector<1x8x8xf32> to vector<8x8xf32>
    %77 = arith.addf %74, %76 : vector<8x8xf32>
    %cst_36 = arith.constant dense<0xFF800000> : vector<8xf32>
    %78 = vector.multi_reduction <maximumf>, %77, %cst_36 [1] : vector<8x8xf32> to vector<8xf32>
    %79 = vector.shape_cast %78 : vector<8xf32> to vector<8x1xf32>
    %80 = vector.broadcast %79 : vector<8x1xf32> to vector<8x8xf32>
    %81 = arith.subf %77, %80 : vector<8x8xf32>
    %82 = math.exp %81 : vector<8x8xf32>
    %cst_37 = arith.constant dense<0.000000e+00> : vector<8xf32>
    %83 = vector.multi_reduction <add>, %82, %cst_37 [1] : vector<8x8xf32> to vector<8xf32>
    %84 = vector.shape_cast %83 : vector<8xf32> to vector<8x1xf32>
    %85 = tpu.reciprocal %84 {approx = true} : vector<8x1xf32> -> vector<8x1xf32>
    %86 = vector.broadcast %85 : vector<8x1xf32> to vector<8x8xf32>
    %87 = arith.mulf %82, %86 : vector<8x8xf32>
    %cst_38 = arith.constant dense<0.000000e+00> : vector<8x16xf32>
    %88 = tpu.matmul %87, %71, %cst_38 {dimension_numbers = #tpu.dot_dimension_numbers<[1], [0], [0], [1], [0, 0, 1, 1], [], []>} : vector<8x8xf32>, vector<8x16xf32>, vector<8x16xf32> -> vector<8x16xf32>
    %89 = tpu.concatenate %68, %88 in 0 : vector<8x16xf32>, vector<8x16xf32> -> vector<16x16xf32>
    %c0_39 = arith.constant 0 : index
    %c0_40 = arith.constant 0 : index
    %c0_41 = arith.constant 0 : index
    %90 = vector.load %arg3[%c0_39, %c0_40, %c0_41] : memref<4x16x32xf32, #tpu.memory_space<vmem>>, vector<1x16x32xf32>
    %91 = vector.shape_cast %90 : vector<1x16x32xf32> to vector<16x32xf32>
    %cst_42 = arith.constant dense<0.000000e+00> : vector<16x32xf32>
    %92 = tpu.matmul %89, %91, %cst_42 {dimension_numbers = #tpu.dot_dimension_numbers<[1], [0], [0], [1], [0, 0, 1, 1], [], []>} : vector<16x16xf32>, vector<16x32xf32>, vector<16x32xf32> -> vector<16x32xf32>
    %c1_43 = arith.constant 1 : index
    %c0_44 = arith.constant 0 : index
    %c0_45 = arith.constant 0 : index
    %93 = vector.load %arg2[%c1_43, %c0_44, %c0_45] : memref<12x32x16xf32, #tpu.memory_space<vmem>>, vector<1x32x16xf32>
    %94 = vector.shape_cast %93 : vector<1x32x16xf32> to vector<32x16xf32>
    %c3 = arith.constant 3 : index
    %c0_46 = arith.constant 0 : index
    %c0_47 = arith.constant 0 : index
    %95 = vector.load %arg2[%c3, %c0_46, %c0_47] : memref<12x32x16xf32, #tpu.memory_space<vmem>>, vector<1x32x16xf32>
    %96 = vector.shape_cast %95 : vector<1x32x16xf32> to vector<32x16xf32>
    %c5 = arith.constant 5 : index
    %c0_48 = arith.constant 0 : index
    %c0_49 = arith.constant 0 : index
    %97 = vector.load %arg2[%c5, %c0_48, %c0_49] : memref<12x32x16xf32, #tpu.memory_space<vmem>>, vector<1x32x16xf32>
    %98 = vector.shape_cast %97 : vector<1x32x16xf32> to vector<32x16xf32>
    %cst_50 = arith.constant dense<0.000000e+00> : vector<16x16xf32>
    %99 = tpu.matmul %30, %94, %cst_50 {dimension_numbers = #tpu.dot_dimension_numbers<[1], [0], [0], [1], [0, 0, 1, 1], [], []>} : vector<16x32xf32>, vector<32x16xf32>, vector<16x16xf32> -> vector<16x16xf32>
    %100 = vector.extract_strided_slice %4 {offsets = [1, 0], sizes = [1, 16], strides = [1, 1]} : vector<6x16xf32> to vector<1x16xf32>
    %101 = vector.broadcast %100 : vector<1x16xf32> to vector<16x16xf32>
    %102 = arith.addf %99, %101 : vector<16x16xf32>
    %cst_51 = arith.constant dense<0.000000e+00> : vector<16x16xf32>
    %103 = tpu.matmul %30, %96, %cst_51 {dimension_numbers = #tpu.dot_dimension_numbers<[1], [0], [0], [1], [0, 0, 1, 1], [], []>} : vector<16x32xf32>, vector<32x16xf32>, vector<16x16xf32> -> vector<16x16xf32>
    %104 = vector.extract_strided_slice %4 {offsets = [3, 0], sizes = [1, 16], strides = [1, 1]} : vector<6x16xf32> to vector<1x16xf32>
    %105 = vector.broadcast %104 : vector<1x16xf32> to vector<16x16xf32>
    %106 = arith.addf %103, %105 : vector<16x16xf32>
    %cst_52 = arith.constant dense<0.000000e+00> : vector<16x16xf32>
    %107 = tpu.matmul %30, %98, %cst_52 {dimension_numbers = #tpu.dot_dimension_numbers<[1], [0], [0], [1], [0, 0, 1, 1], [], []>} : vector<16x32xf32>, vector<32x16xf32>, vector<16x16xf32> -> vector<16x16xf32>
    %108 = vector.extract_strided_slice %4 {offsets = [5, 0], sizes = [1, 16], strides = [1, 1]} : vector<6x16xf32> to vector<1x16xf32>
    %109 = vector.broadcast %108 : vector<1x16xf32> to vector<16x16xf32>
    %110 = arith.addf %107, %109 : vector<16x16xf32>
    %111 = vector.extract_strided_slice %102 {offsets = [0, 0], sizes = [8, 16], strides = [1, 1]} : vector<16x16xf32> to vector<8x16xf32>
    %112 = vector.extract_strided_slice %106 {offsets = [0, 0], sizes = [8, 16], strides = [1, 1]} : vector<16x16xf32> to vector<8x16xf32>
    %113 = vector.extract_strided_slice %110 {offsets = [0, 0], sizes = [8, 16], strides = [1, 1]} : vector<16x16xf32> to vector<8x16xf32>
    %cst_53 = arith.constant dense<0.000000e+00> : vector<8x8xf32>
    %114 = tpu.matmul %111, %112, %cst_53 {dimension_numbers = #tpu.dot_dimension_numbers<[1], [1], [0], [0], [0, 0, 1, 0], [], []>} : vector<8x16xf32>, vector<8x16xf32>, vector<8x8xf32> -> vector<8x8xf32>
    %cst_54 = arith.constant 2.500000e-01 : f32
    %115 = vector.broadcast %cst_54 : f32 to vector<8x8xf32>
    %116 = arith.mulf %114, %115 : vector<8x8xf32>
    %c0_55 = arith.constant 0 : index
    %c0_56 = arith.constant 0 : index
    %c0_57 = arith.constant 0 : index
    %117 = vector.load %arg1[%c0_55, %c0_56, %c0_57] : memref<2x8x8xf32, #tpu.memory_space<vmem>>, vector<1x8x8xf32>
    %118 = vector.shape_cast %117 : vector<1x8x8xf32> to vector<8x8xf32>
    %119 = arith.addf %116, %118 : vector<8x8xf32>
    %cst_58 = arith.constant dense<0xFF800000> : vector<8xf32>
    %120 = vector.multi_reduction <maximumf>, %119, %cst_58 [1] : vector<8x8xf32> to vector<8xf32>
    %121 = vector.shape_cast %120 : vector<8xf32> to vector<8x1xf32>
    %122 = vector.broadcast %121 : vector<8x1xf32> to vector<8x8xf32>
    %123 = arith.subf %119, %122 : vector<8x8xf32>
    %124 = math.exp %123 : vector<8x8xf32>
    %cst_59 = arith.constant dense<0.000000e+00> : vector<8xf32>
    %125 = vector.multi_reduction <add>, %124, %cst_59 [1] : vector<8x8xf32> to vector<8xf32>
    %126 = vector.shape_cast %125 : vector<8xf32> to vector<8x1xf32>
    %127 = tpu.reciprocal %126 {approx = true} : vector<8x1xf32> -> vector<8x1xf32>
    %128 = vector.broadcast %127 : vector<8x1xf32> to vector<8x8xf32>
    %129 = arith.mulf %124, %128 : vector<8x8xf32>
    %cst_60 = arith.constant dense<0.000000e+00> : vector<8x16xf32>
    %130 = tpu.matmul %129, %113, %cst_60 {dimension_numbers = #tpu.dot_dimension_numbers<[1], [0], [0], [1], [0, 0, 1, 1], [], []>} : vector<8x8xf32>, vector<8x16xf32>, vector<8x16xf32> -> vector<8x16xf32>
    %131 = vector.extract_strided_slice %102 {offsets = [8, 0], sizes = [8, 16], strides = [1, 1]} : vector<16x16xf32> to vector<8x16xf32>
    %132 = vector.extract_strided_slice %106 {offsets = [8, 0], sizes = [8, 16], strides = [1, 1]} : vector<16x16xf32> to vector<8x16xf32>
    %133 = vector.extract_strided_slice %110 {offsets = [8, 0], sizes = [8, 16], strides = [1, 1]} : vector<16x16xf32> to vector<8x16xf32>
    %cst_61 = arith.constant dense<0.000000e+00> : vector<8x8xf32>
    %134 = tpu.matmul %131, %132, %cst_61 {dimension_numbers = #tpu.dot_dimension_numbers<[1], [1], [0], [0], [0, 0, 1, 0], [], []>} : vector<8x16xf32>, vector<8x16xf32>, vector<8x8xf32> -> vector<8x8xf32>
    %cst_62 = arith.constant 2.500000e-01 : f32
    %135 = vector.broadcast %cst_62 : f32 to vector<8x8xf32>
    %136 = arith.mulf %134, %135 : vector<8x8xf32>
    %c1_63 = arith.constant 1 : index
    %c0_64 = arith.constant 0 : index
    %c0_65 = arith.constant 0 : index
    %137 = vector.load %arg1[%c1_63, %c0_64, %c0_65] : memref<2x8x8xf32, #tpu.memory_space<vmem>>, vector<1x8x8xf32>
    %138 = vector.shape_cast %137 : vector<1x8x8xf32> to vector<8x8xf32>
    %139 = arith.addf %136, %138 : vector<8x8xf32>
    %cst_66 = arith.constant dense<0xFF800000> : vector<8xf32>
    %140 = vector.multi_reduction <maximumf>, %139, %cst_66 [1] : vector<8x8xf32> to vector<8xf32>
    %141 = vector.shape_cast %140 : vector<8xf32> to vector<8x1xf32>
    %142 = vector.broadcast %141 : vector<8x1xf32> to vector<8x8xf32>
    %143 = arith.subf %139, %142 : vector<8x8xf32>
    %144 = math.exp %143 : vector<8x8xf32>
    %cst_67 = arith.constant dense<0.000000e+00> : vector<8xf32>
    %145 = vector.multi_reduction <add>, %144, %cst_67 [1] : vector<8x8xf32> to vector<8xf32>
    %146 = vector.shape_cast %145 : vector<8xf32> to vector<8x1xf32>
    %147 = tpu.reciprocal %146 {approx = true} : vector<8x1xf32> -> vector<8x1xf32>
    %148 = vector.broadcast %147 : vector<8x1xf32> to vector<8x8xf32>
    %149 = arith.mulf %144, %148 : vector<8x8xf32>
    %cst_68 = arith.constant dense<0.000000e+00> : vector<8x16xf32>
    %150 = tpu.matmul %149, %133, %cst_68 {dimension_numbers = #tpu.dot_dimension_numbers<[1], [0], [0], [1], [0, 0, 1, 1], [], []>} : vector<8x8xf32>, vector<8x16xf32>, vector<8x16xf32> -> vector<8x16xf32>
    %151 = tpu.concatenate %130, %150 in 0 : vector<8x16xf32>, vector<8x16xf32> -> vector<16x16xf32>
    %c1_69 = arith.constant 1 : index
    %c0_70 = arith.constant 0 : index
    %c0_71 = arith.constant 0 : index
    %152 = vector.load %arg3[%c1_69, %c0_70, %c0_71] : memref<4x16x32xf32, #tpu.memory_space<vmem>>, vector<1x16x32xf32>
    %153 = vector.shape_cast %152 : vector<1x16x32xf32> to vector<16x32xf32>
    %cst_72 = arith.constant dense<0.000000e+00> : vector<16x32xf32>
    %154 = tpu.matmul %151, %153, %cst_72 {dimension_numbers = #tpu.dot_dimension_numbers<[1], [0], [0], [1], [0, 0, 1, 1], [], []>} : vector<16x16xf32>, vector<16x32xf32>, vector<16x32xf32> -> vector<16x32xf32>
    %155 = arith.addf %92, %154 : vector<16x32xf32>
    %156 = arith.addf %0, %155 : vector<16x32xf32>
    %157 = vector.extract_strided_slice %6 {offsets = [0, 0], sizes = [1, 32], strides = [1, 1]} : vector<2x32xf32> to vector<1x32xf32>
    %158 = vector.broadcast %157 : vector<1x32xf32> to vector<16x32xf32>
    %159 = arith.addf %156, %158 : vector<16x32xf32>
    %160 = vector.extract_strided_slice %2 {offsets = [2, 0], sizes = [1, 32], strides = [1, 1]} : vector<4x32xf32> to vector<1x32xf32>
    %161 = vector.extract_strided_slice %2 {offsets = [3, 0], sizes = [1, 32], strides = [1, 1]} : vector<4x32xf32> to vector<1x32xf32>
    %cst_73 = arith.constant dense<0.000000e+00> : vector<16xf32>
    %162 = vector.multi_reduction <add>, %159, %cst_73 [1] : vector<16x32xf32> to vector<16xf32>
    %163 = vector.shape_cast %162 : vector<16xf32> to vector<16x1xf32>
    %cst_74 = arith.constant 3.200000e+01 : f32
    %164 = vector.broadcast %cst_74 : f32 to vector<16x1xf32>
    %165 = arith.divf %163, %164 : vector<16x1xf32>
    %166 = vector.broadcast %165 : vector<16x1xf32> to vector<16x32xf32>
    %167 = arith.subf %159, %166 : vector<16x32xf32>
    %168 = arith.mulf %167, %167 : vector<16x32xf32>
    %cst_75 = arith.constant dense<0.000000e+00> : vector<16xf32>
    %169 = vector.multi_reduction <add>, %168, %cst_75 [1] : vector<16x32xf32> to vector<16xf32>
    %170 = vector.shape_cast %169 : vector<16xf32> to vector<16x1xf32>
    %cst_76 = arith.constant 3.200000e+01 : f32
    %171 = vector.broadcast %cst_76 : f32 to vector<16x1xf32>
    %172 = arith.divf %170, %171 : vector<16x1xf32>
    %173 = vector.broadcast %165 : vector<16x1xf32> to vector<16x32xf32>
    %174 = arith.subf %159, %173 : vector<16x32xf32>
    %cst_77 = arith.constant 9.99999974E-6 : f32
    %175 = vector.broadcast %cst_77 : f32 to vector<16x1xf32>
    %176 = arith.addf %172, %175 : vector<16x1xf32>
    %177 = math.rsqrt %176 : vector<16x1xf32>
    %178 = vector.broadcast %177 : vector<16x1xf32> to vector<16x32xf32>
    %179 = arith.mulf %174, %178 : vector<16x32xf32>
    %180 = vector.broadcast %160 : vector<1x32xf32> to vector<16x32xf32>
    %181 = arith.mulf %179, %180 : vector<16x32xf32>
    %182 = vector.broadcast %161 : vector<1x32xf32> to vector<16x32xf32>
    %183 = arith.addf %181, %182 : vector<16x32xf32>
    %c0_78 = arith.constant 0 : index
    %c0_79 = arith.constant 0 : index
    %c0_80 = arith.constant 0 : index
    %184 = vector.load %arg4[%c0_78, %c0_79, %c0_80] : memref<2x32x128xf32, #tpu.memory_space<vmem>>, vector<1x32x128xf32>
    %185 = vector.shape_cast %184 : vector<1x32x128xf32> to vector<32x128xf32>
    %cst_81 = arith.constant dense<0.000000e+00> : vector<16x128xf32>
    %186 = tpu.matmul %183, %185, %cst_81 {dimension_numbers = #tpu.dot_dimension_numbers<[1], [0], [0], [1], [0, 0, 1, 1], [], []>} : vector<16x32xf32>, vector<32x128xf32>, vector<16x128xf32> -> vector<16x128xf32>
    %c0_82 = arith.constant 0 : index
    %c0_83 = arith.constant 0 : index
    %c0_84 = arith.constant 0 : index
    %187 = vector.load %arg9[%c0_82, %c0_83, %c0_84] : memref<2x1x128xf32, #tpu.memory_space<vmem>>, vector<1x1x128xf32>
    %188 = vector.shape_cast %187 : vector<1x1x128xf32> to vector<1x128xf32>
    %189 = vector.broadcast %188 : vector<1x128xf32> to vector<16x128xf32>
    %190 = arith.addf %186, %189 : vector<16x128xf32>
    %cst_85 = arith.constant 5.000000e-01 : f32
    %191 = vector.broadcast %cst_85 : f32 to vector<16x128xf32>
    %192 = arith.mulf %191, %190 : vector<16x128xf32>
    %cst_86 = arith.constant 4.471500e-02 : f32
    %193 = vector.broadcast %cst_86 : f32 to vector<16x128xf32>
    %194 = arith.mulf %193, %190 : vector<16x128xf32>
    %195 = arith.mulf %194, %190 : vector<16x128xf32>
    %196 = arith.mulf %195, %190 : vector<16x128xf32>
    %197 = arith.addf %190, %196 : vector<16x128xf32>
    %cst_87 = arith.constant 0.797884583 : f32
    %198 = vector.broadcast %cst_87 : f32 to vector<16x128xf32>
    %199 = arith.mulf %198, %197 : vector<16x128xf32>
    %200 = math.tanh %199 : vector<16x128xf32>
    %cst_88 = arith.constant 1.000000e+00 : f32
    %201 = vector.broadcast %cst_88 : f32 to vector<16x128xf32>
    %202 = arith.addf %201, %200 : vector<16x128xf32>
    %203 = arith.mulf %192, %202 : vector<16x128xf32>
    %c0_89 = arith.constant 0 : index
    %c0_90 = arith.constant 0 : index
    %c0_91 = arith.constant 0 : index
    %204 = vector.load %arg5[%c0_89, %c0_90, %c0_91] : memref<2x128x32xf32, #tpu.memory_space<vmem>>, vector<1x128x32xf32>
    %205 = vector.shape_cast %204 : vector<1x128x32xf32> to vector<128x32xf32>
    %cst_92 = arith.constant dense<0.000000e+00> : vector<16x32xf32>
    %206 = tpu.matmul %203, %205, %cst_92 {dimension_numbers = #tpu.dot_dimension_numbers<[1], [0], [0], [1], [0, 0, 1, 1], [], []>} : vector<16x128xf32>, vector<128x32xf32>, vector<16x32xf32> -> vector<16x32xf32>
    %207 = vector.extract_strided_slice %6 {offsets = [1, 0], sizes = [1, 32], strides = [1, 1]} : vector<2x32xf32> to vector<1x32xf32>
    %208 = vector.broadcast %207 : vector<1x32xf32> to vector<16x32xf32>
    %209 = arith.addf %206, %208 : vector<16x32xf32>
    %210 = arith.addf %159, %209 : vector<16x32xf32>
    %c1_93 = arith.constant 1 : index
    %c0_94 = arith.constant 0 : index
    %c0_95 = arith.constant 0 : index
    %211 = vector.load %arg6[%c1_93, %c0_94, %c0_95] : memref<2x4x32xf32, #tpu.memory_space<vmem>>, vector<1x4x32xf32>
    %212 = vector.shape_cast %211 : vector<1x4x32xf32> to vector<4x32xf32>
    %c1_96 = arith.constant 1 : index
    %c0_97 = arith.constant 0 : index
    %c0_98 = arith.constant 0 : index
    %213 = vector.load %arg7[%c1_96, %c0_97, %c0_98] : memref<2x6x16xf32, #tpu.memory_space<vmem>>, vector<1x6x16xf32>
    %214 = vector.shape_cast %213 : vector<1x6x16xf32> to vector<6x16xf32>
    %c1_99 = arith.constant 1 : index
    %c0_100 = arith.constant 0 : index
    %c0_101 = arith.constant 0 : index
    %215 = vector.load %arg8[%c1_99, %c0_100, %c0_101] : memref<2x2x32xf32, #tpu.memory_space<vmem>>, vector<1x2x32xf32>
    %216 = vector.shape_cast %215 : vector<1x2x32xf32> to vector<2x32xf32>
    %217 = vector.extract_strided_slice %212 {offsets = [0, 0], sizes = [1, 32], strides = [1, 1]} : vector<4x32xf32> to vector<1x32xf32>
    %218 = vector.extract_strided_slice %212 {offsets = [1, 0], sizes = [1, 32], strides = [1, 1]} : vector<4x32xf32> to vector<1x32xf32>
    %cst_102 = arith.constant dense<0.000000e+00> : vector<16xf32>
    %219 = vector.multi_reduction <add>, %210, %cst_102 [1] : vector<16x32xf32> to vector<16xf32>
    %220 = vector.shape_cast %219 : vector<16xf32> to vector<16x1xf32>
    %cst_103 = arith.constant 3.200000e+01 : f32
    %221 = vector.broadcast %cst_103 : f32 to vector<16x1xf32>
    %222 = arith.divf %220, %221 : vector<16x1xf32>
    %223 = vector.broadcast %222 : vector<16x1xf32> to vector<16x32xf32>
    %224 = arith.subf %210, %223 : vector<16x32xf32>
    %225 = arith.mulf %224, %224 : vector<16x32xf32>
    %cst_104 = arith.constant dense<0.000000e+00> : vector<16xf32>
    %226 = vector.multi_reduction <add>, %225, %cst_104 [1] : vector<16x32xf32> to vector<16xf32>
    %227 = vector.shape_cast %226 : vector<16xf32> to vector<16x1xf32>
    %cst_105 = arith.constant 3.200000e+01 : f32
    %228 = vector.broadcast %cst_105 : f32 to vector<16x1xf32>
    %229 = arith.divf %227, %228 : vector<16x1xf32>
    %230 = vector.broadcast %222 : vector<16x1xf32> to vector<16x32xf32>
    %231 = arith.subf %210, %230 : vector<16x32xf32>
    %cst_106 = arith.constant 9.99999974E-6 : f32
    %232 = vector.broadcast %cst_106 : f32 to vector<16x1xf32>
    %233 = arith.addf %229, %232 : vector<16x1xf32>
    %234 = math.rsqrt %233 : vector<16x1xf32>
    %235 = vector.broadcast %234 : vector<16x1xf32> to vector<16x32xf32>
    %236 = arith.mulf %231, %235 : vector<16x32xf32>
    %237 = vector.broadcast %217 : vector<1x32xf32> to vector<16x32xf32>
    %238 = arith.mulf %236, %237 : vector<16x32xf32>
    %239 = vector.broadcast %218 : vector<1x32xf32> to vector<16x32xf32>
    %240 = arith.addf %238, %239 : vector<16x32xf32>
    %c6 = arith.constant 6 : index
    %c0_107 = arith.constant 0 : index
    %c0_108 = arith.constant 0 : index
    %241 = vector.load %arg2[%c6, %c0_107, %c0_108] : memref<12x32x16xf32, #tpu.memory_space<vmem>>, vector<1x32x16xf32>
    %242 = vector.shape_cast %241 : vector<1x32x16xf32> to vector<32x16xf32>
    %c8 = arith.constant 8 : index
    %c0_109 = arith.constant 0 : index
    %c0_110 = arith.constant 0 : index
    %243 = vector.load %arg2[%c8, %c0_109, %c0_110] : memref<12x32x16xf32, #tpu.memory_space<vmem>>, vector<1x32x16xf32>
    %244 = vector.shape_cast %243 : vector<1x32x16xf32> to vector<32x16xf32>
    %c10 = arith.constant 10 : index
    %c0_111 = arith.constant 0 : index
    %c0_112 = arith.constant 0 : index
    %245 = vector.load %arg2[%c10, %c0_111, %c0_112] : memref<12x32x16xf32, #tpu.memory_space<vmem>>, vector<1x32x16xf32>
    %246 = vector.shape_cast %245 : vector<1x32x16xf32> to vector<32x16xf32>
    %cst_113 = arith.constant dense<0.000000e+00> : vector<16x16xf32>
    %247 = tpu.matmul %240, %242, %cst_113 {dimension_numbers = #tpu.dot_dimension_numbers<[1], [0], [0], [1], [0, 0, 1, 1], [], []>} : vector<16x32xf32>, vector<32x16xf32>, vector<16x16xf32> -> vector<16x16xf32>
    %248 = vector.extract_strided_slice %214 {offsets = [0, 0], sizes = [1, 16], strides = [1, 1]} : vector<6x16xf32> to vector<1x16xf32>
    %249 = vector.broadcast %248 : vector<1x16xf32> to vector<16x16xf32>
    %250 = arith.addf %247, %249 : vector<16x16xf32>
    %cst_114 = arith.constant dense<0.000000e+00> : vector<16x16xf32>
    %251 = tpu.matmul %240, %244, %cst_114 {dimension_numbers = #tpu.dot_dimension_numbers<[1], [0], [0], [1], [0, 0, 1, 1], [], []>} : vector<16x32xf32>, vector<32x16xf32>, vector<16x16xf32> -> vector<16x16xf32>
    %252 = vector.extract_strided_slice %214 {offsets = [2, 0], sizes = [1, 16], strides = [1, 1]} : vector<6x16xf32> to vector<1x16xf32>
    %253 = vector.broadcast %252 : vector<1x16xf32> to vector<16x16xf32>
    %254 = arith.addf %251, %253 : vector<16x16xf32>
    %cst_115 = arith.constant dense<0.000000e+00> : vector<16x16xf32>
    %255 = tpu.matmul %240, %246, %cst_115 {dimension_numbers = #tpu.dot_dimension_numbers<[1], [0], [0], [1], [0, 0, 1, 1], [], []>} : vector<16x32xf32>, vector<32x16xf32>, vector<16x16xf32> -> vector<16x16xf32>
    %256 = vector.extract_strided_slice %214 {offsets = [4, 0], sizes = [1, 16], strides = [1, 1]} : vector<6x16xf32> to vector<1x16xf32>
    %257 = vector.broadcast %256 : vector<1x16xf32> to vector<16x16xf32>
    %258 = arith.addf %255, %257 : vector<16x16xf32>
    %259 = vector.extract_strided_slice %250 {offsets = [0, 0], sizes = [8, 16], strides = [1, 1]} : vector<16x16xf32> to vector<8x16xf32>
    %260 = vector.extract_strided_slice %254 {offsets = [0, 0], sizes = [8, 16], strides = [1, 1]} : vector<16x16xf32> to vector<8x16xf32>
    %261 = vector.extract_strided_slice %258 {offsets = [0, 0], sizes = [8, 16], strides = [1, 1]} : vector<16x16xf32> to vector<8x16xf32>
    %cst_116 = arith.constant dense<0.000000e+00> : vector<8x8xf32>
    %262 = tpu.matmul %259, %260, %cst_116 {dimension_numbers = #tpu.dot_dimension_numbers<[1], [1], [0], [0], [0, 0, 1, 0], [], []>} : vector<8x16xf32>, vector<8x16xf32>, vector<8x8xf32> -> vector<8x8xf32>
    %cst_117 = arith.constant 2.500000e-01 : f32
    %263 = vector.broadcast %cst_117 : f32 to vector<8x8xf32>
    %264 = arith.mulf %262, %263 : vector<8x8xf32>
    %c0_118 = arith.constant 0 : index
    %c0_119 = arith.constant 0 : index
    %c0_120 = arith.constant 0 : index
    %265 = vector.load %arg1[%c0_118, %c0_119, %c0_120] : memref<2x8x8xf32, #tpu.memory_space<vmem>>, vector<1x8x8xf32>
    %266 = vector.shape_cast %265 : vector<1x8x8xf32> to vector<8x8xf32>
    %267 = arith.addf %264, %266 : vector<8x8xf32>
    %cst_121 = arith.constant dense<0xFF800000> : vector<8xf32>
    %268 = vector.multi_reduction <maximumf>, %267, %cst_121 [1] : vector<8x8xf32> to vector<8xf32>
    %269 = vector.shape_cast %268 : vector<8xf32> to vector<8x1xf32>
    %270 = vector.broadcast %269 : vector<8x1xf32> to vector<8x8xf32>
    %271 = arith.subf %267, %270 : vector<8x8xf32>
    %272 = math.exp %271 : vector<8x8xf32>
    %cst_122 = arith.constant dense<0.000000e+00> : vector<8xf32>
    %273 = vector.multi_reduction <add>, %272, %cst_122 [1] : vector<8x8xf32> to vector<8xf32>
    %274 = vector.shape_cast %273 : vector<8xf32> to vector<8x1xf32>
    %275 = tpu.reciprocal %274 {approx = true} : vector<8x1xf32> -> vector<8x1xf32>
    %276 = vector.broadcast %275 : vector<8x1xf32> to vector<8x8xf32>
    %277 = arith.mulf %272, %276 : vector<8x8xf32>
    %cst_123 = arith.constant dense<0.000000e+00> : vector<8x16xf32>
    %278 = tpu.matmul %277, %261, %cst_123 {dimension_numbers = #tpu.dot_dimension_numbers<[1], [0], [0], [1], [0, 0, 1, 1], [], []>} : vector<8x8xf32>, vector<8x16xf32>, vector<8x16xf32> -> vector<8x16xf32>
    %279 = vector.extract_strided_slice %250 {offsets = [8, 0], sizes = [8, 16], strides = [1, 1]} : vector<16x16xf32> to vector<8x16xf32>
    %280 = vector.extract_strided_slice %254 {offsets = [8, 0], sizes = [8, 16], strides = [1, 1]} : vector<16x16xf32> to vector<8x16xf32>
    %281 = vector.extract_strided_slice %258 {offsets = [8, 0], sizes = [8, 16], strides = [1, 1]} : vector<16x16xf32> to vector<8x16xf32>
    %cst_124 = arith.constant dense<0.000000e+00> : vector<8x8xf32>
    %282 = tpu.matmul %279, %280, %cst_124 {dimension_numbers = #tpu.dot_dimension_numbers<[1], [1], [0], [0], [0, 0, 1, 0], [], []>} : vector<8x16xf32>, vector<8x16xf32>, vector<8x8xf32> -> vector<8x8xf32>
    %cst_125 = arith.constant 2.500000e-01 : f32
    %283 = vector.broadcast %cst_125 : f32 to vector<8x8xf32>
    %284 = arith.mulf %282, %283 : vector<8x8xf32>
    %c1_126 = arith.constant 1 : index
    %c0_127 = arith.constant 0 : index
    %c0_128 = arith.constant 0 : index
    %285 = vector.load %arg1[%c1_126, %c0_127, %c0_128] : memref<2x8x8xf32, #tpu.memory_space<vmem>>, vector<1x8x8xf32>
    %286 = vector.shape_cast %285 : vector<1x8x8xf32> to vector<8x8xf32>
    %287 = arith.addf %284, %286 : vector<8x8xf32>
    %cst_129 = arith.constant dense<0xFF800000> : vector<8xf32>
    %288 = vector.multi_reduction <maximumf>, %287, %cst_129 [1] : vector<8x8xf32> to vector<8xf32>
    %289 = vector.shape_cast %288 : vector<8xf32> to vector<8x1xf32>
    %290 = vector.broadcast %289 : vector<8x1xf32> to vector<8x8xf32>
    %291 = arith.subf %287, %290 : vector<8x8xf32>
    %292 = math.exp %291 : vector<8x8xf32>
    %cst_130 = arith.constant dense<0.000000e+00> : vector<8xf32>
    %293 = vector.multi_reduction <add>, %292, %cst_130 [1] : vector<8x8xf32> to vector<8xf32>
    %294 = vector.shape_cast %293 : vector<8xf32> to vector<8x1xf32>
    %295 = tpu.reciprocal %294 {approx = true} : vector<8x1xf32> -> vector<8x1xf32>
    %296 = vector.broadcast %295 : vector<8x1xf32> to vector<8x8xf32>
    %297 = arith.mulf %292, %296 : vector<8x8xf32>
    %cst_131 = arith.constant dense<0.000000e+00> : vector<8x16xf32>
    %298 = tpu.matmul %297, %281, %cst_131 {dimension_numbers = #tpu.dot_dimension_numbers<[1], [0], [0], [1], [0, 0, 1, 1], [], []>} : vector<8x8xf32>, vector<8x16xf32>, vector<8x16xf32> -> vector<8x16xf32>
    %299 = tpu.concatenate %278, %298 in 0 : vector<8x16xf32>, vector<8x16xf32> -> vector<16x16xf32>
    %c2_132 = arith.constant 2 : index
    %c0_133 = arith.constant 0 : index
    %c0_134 = arith.constant 0 : index
    %300 = vector.load %arg3[%c2_132, %c0_133, %c0_134] : memref<4x16x32xf32, #tpu.memory_space<vmem>>, vector<1x16x32xf32>
    %301 = vector.shape_cast %300 : vector<1x16x32xf32> to vector<16x32xf32>
    %cst_135 = arith.constant dense<0.000000e+00> : vector<16x32xf32>
    %302 = tpu.matmul %299, %301, %cst_135 {dimension_numbers = #tpu.dot_dimension_numbers<[1], [0], [0], [1], [0, 0, 1, 1], [], []>} : vector<16x16xf32>, vector<16x32xf32>, vector<16x32xf32> -> vector<16x32xf32>
    %c7 = arith.constant 7 : index
    %c0_136 = arith.constant 0 : index
    %c0_137 = arith.constant 0 : index
    %303 = vector.load %arg2[%c7, %c0_136, %c0_137] : memref<12x32x16xf32, #tpu.memory_space<vmem>>, vector<1x32x16xf32>
    %304 = vector.shape_cast %303 : vector<1x32x16xf32> to vector<32x16xf32>
    %c9 = arith.constant 9 : index
    %c0_138 = arith.constant 0 : index
    %c0_139 = arith.constant 0 : index
    %305 = vector.load %arg2[%c9, %c0_138, %c0_139] : memref<12x32x16xf32, #tpu.memory_space<vmem>>, vector<1x32x16xf32>
    %306 = vector.shape_cast %305 : vector<1x32x16xf32> to vector<32x16xf32>
    %c11 = arith.constant 11 : index
    %c0_140 = arith.constant 0 : index
    %c0_141 = arith.constant 0 : index
    %307 = vector.load %arg2[%c11, %c0_140, %c0_141] : memref<12x32x16xf32, #tpu.memory_space<vmem>>, vector<1x32x16xf32>
    %308 = vector.shape_cast %307 : vector<1x32x16xf32> to vector<32x16xf32>
    %cst_142 = arith.constant dense<0.000000e+00> : vector<16x16xf32>
    %309 = tpu.matmul %240, %304, %cst_142 {dimension_numbers = #tpu.dot_dimension_numbers<[1], [0], [0], [1], [0, 0, 1, 1], [], []>} : vector<16x32xf32>, vector<32x16xf32>, vector<16x16xf32> -> vector<16x16xf32>
    %310 = vector.extract_strided_slice %214 {offsets = [1, 0], sizes = [1, 16], strides = [1, 1]} : vector<6x16xf32> to vector<1x16xf32>
    %311 = vector.broadcast %310 : vector<1x16xf32> to vector<16x16xf32>
    %312 = arith.addf %309, %311 : vector<16x16xf32>
    %cst_143 = arith.constant dense<0.000000e+00> : vector<16x16xf32>
    %313 = tpu.matmul %240, %306, %cst_143 {dimension_numbers = #tpu.dot_dimension_numbers<[1], [0], [0], [1], [0, 0, 1, 1], [], []>} : vector<16x32xf32>, vector<32x16xf32>, vector<16x16xf32> -> vector<16x16xf32>
    %314 = vector.extract_strided_slice %214 {offsets = [3, 0], sizes = [1, 16], strides = [1, 1]} : vector<6x16xf32> to vector<1x16xf32>
    %315 = vector.broadcast %314 : vector<1x16xf32> to vector<16x16xf32>
    %316 = arith.addf %313, %315 : vector<16x16xf32>
    %cst_144 = arith.constant dense<0.000000e+00> : vector<16x16xf32>
    %317 = tpu.matmul %240, %308, %cst_144 {dimension_numbers = #tpu.dot_dimension_numbers<[1], [0], [0], [1], [0, 0, 1, 1], [], []>} : vector<16x32xf32>, vector<32x16xf32>, vector<16x16xf32> -> vector<16x16xf32>
    %318 = vector.extract_strided_slice %214 {offsets = [5, 0], sizes = [1, 16], strides = [1, 1]} : vector<6x16xf32> to vector<1x16xf32>
    %319 = vector.broadcast %318 : vector<1x16xf32> to vector<16x16xf32>
    %320 = arith.addf %317, %319 : vector<16x16xf32>
    %321 = vector.extract_strided_slice %312 {offsets = [0, 0], sizes = [8, 16], strides = [1, 1]} : vector<16x16xf32> to vector<8x16xf32>
    %322 = vector.extract_strided_slice %316 {offsets = [0, 0], sizes = [8, 16], strides = [1, 1]} : vector<16x16xf32> to vector<8x16xf32>
    %323 = vector.extract_strided_slice %320 {offsets = [0, 0], sizes = [8, 16], strides = [1, 1]} : vector<16x16xf32> to vector<8x16xf32>
    %cst_145 = arith.constant dense<0.000000e+00> : vector<8x8xf32>
    %324 = tpu.matmul %321, %322, %cst_145 {dimension_numbers = #tpu.dot_dimension_numbers<[1], [1], [0], [0], [0, 0, 1, 0], [], []>} : vector<8x16xf32>, vector<8x16xf32>, vector<8x8xf32> -> vector<8x8xf32>
    %cst_146 = arith.constant 2.500000e-01 : f32
    %325 = vector.broadcast %cst_146 : f32 to vector<8x8xf32>
    %326 = arith.mulf %324, %325 : vector<8x8xf32>
    %c0_147 = arith.constant 0 : index
    %c0_148 = arith.constant 0 : index
    %c0_149 = arith.constant 0 : index
    %327 = vector.load %arg1[%c0_147, %c0_148, %c0_149] : memref<2x8x8xf32, #tpu.memory_space<vmem>>, vector<1x8x8xf32>
    %328 = vector.shape_cast %327 : vector<1x8x8xf32> to vector<8x8xf32>
    %329 = arith.addf %326, %328 : vector<8x8xf32>
    %cst_150 = arith.constant dense<0xFF800000> : vector<8xf32>
    %330 = vector.multi_reduction <maximumf>, %329, %cst_150 [1] : vector<8x8xf32> to vector<8xf32>
    %331 = vector.shape_cast %330 : vector<8xf32> to vector<8x1xf32>
    %332 = vector.broadcast %331 : vector<8x1xf32> to vector<8x8xf32>
    %333 = arith.subf %329, %332 : vector<8x8xf32>
    %334 = math.exp %333 : vector<8x8xf32>
    %cst_151 = arith.constant dense<0.000000e+00> : vector<8xf32>
    %335 = vector.multi_reduction <add>, %334, %cst_151 [1] : vector<8x8xf32> to vector<8xf32>
    %336 = vector.shape_cast %335 : vector<8xf32> to vector<8x1xf32>
    %337 = tpu.reciprocal %336 {approx = true} : vector<8x1xf32> -> vector<8x1xf32>
    %338 = vector.broadcast %337 : vector<8x1xf32> to vector<8x8xf32>
    %339 = arith.mulf %334, %338 : vector<8x8xf32>
    %cst_152 = arith.constant dense<0.000000e+00> : vector<8x16xf32>
    %340 = tpu.matmul %339, %323, %cst_152 {dimension_numbers = #tpu.dot_dimension_numbers<[1], [0], [0], [1], [0, 0, 1, 1], [], []>} : vector<8x8xf32>, vector<8x16xf32>, vector<8x16xf32> -> vector<8x16xf32>
    %341 = vector.extract_strided_slice %312 {offsets = [8, 0], sizes = [8, 16], strides = [1, 1]} : vector<16x16xf32> to vector<8x16xf32>
    %342 = vector.extract_strided_slice %316 {offsets = [8, 0], sizes = [8, 16], strides = [1, 1]} : vector<16x16xf32> to vector<8x16xf32>
    %343 = vector.extract_strided_slice %320 {offsets = [8, 0], sizes = [8, 16], strides = [1, 1]} : vector<16x16xf32> to vector<8x16xf32>
    %cst_153 = arith.constant dense<0.000000e+00> : vector<8x8xf32>
    %344 = tpu.matmul %341, %342, %cst_153 {dimension_numbers = #tpu.dot_dimension_numbers<[1], [1], [0], [0], [0, 0, 1, 0], [], []>} : vector<8x16xf32>, vector<8x16xf32>, vector<8x8xf32> -> vector<8x8xf32>
    %cst_154 = arith.constant 2.500000e-01 : f32
    %345 = vector.broadcast %cst_154 : f32 to vector<8x8xf32>
    %346 = arith.mulf %344, %345 : vector<8x8xf32>
    %c1_155 = arith.constant 1 : index
    %c0_156 = arith.constant 0 : index
    %c0_157 = arith.constant 0 : index
    %347 = vector.load %arg1[%c1_155, %c0_156, %c0_157] : memref<2x8x8xf32, #tpu.memory_space<vmem>>, vector<1x8x8xf32>
    %348 = vector.shape_cast %347 : vector<1x8x8xf32> to vector<8x8xf32>
    %349 = arith.addf %346, %348 : vector<8x8xf32>
    %cst_158 = arith.constant dense<0xFF800000> : vector<8xf32>
    %350 = vector.multi_reduction <maximumf>, %349, %cst_158 [1] : vector<8x8xf32> to vector<8xf32>
    %351 = vector.shape_cast %350 : vector<8xf32> to vector<8x1xf32>
    %352 = vector.broadcast %351 : vector<8x1xf32> to vector<8x8xf32>
    %353 = arith.subf %349, %352 : vector<8x8xf32>
    %354 = math.exp %353 : vector<8x8xf32>
    %cst_159 = arith.constant dense<0.000000e+00> : vector<8xf32>
    %355 = vector.multi_reduction <add>, %354, %cst_159 [1] : vector<8x8xf32> to vector<8xf32>
    %356 = vector.shape_cast %355 : vector<8xf32> to vector<8x1xf32>
    %357 = tpu.reciprocal %356 {approx = true} : vector<8x1xf32> -> vector<8x1xf32>
    %358 = vector.broadcast %357 : vector<8x1xf32> to vector<8x8xf32>
    %359 = arith.mulf %354, %358 : vector<8x8xf32>
    %cst_160 = arith.constant dense<0.000000e+00> : vector<8x16xf32>
    %360 = tpu.matmul %359, %343, %cst_160 {dimension_numbers = #tpu.dot_dimension_numbers<[1], [0], [0], [1], [0, 0, 1, 1], [], []>} : vector<8x8xf32>, vector<8x16xf32>, vector<8x16xf32> -> vector<8x16xf32>
    %361 = tpu.concatenate %340, %360 in 0 : vector<8x16xf32>, vector<8x16xf32> -> vector<16x16xf32>
    %c3_161 = arith.constant 3 : index
    %c0_162 = arith.constant 0 : index
    %c0_163 = arith.constant 0 : index
    %362 = vector.load %arg3[%c3_161, %c0_162, %c0_163] : memref<4x16x32xf32, #tpu.memory_space<vmem>>, vector<1x16x32xf32>
    %363 = vector.shape_cast %362 : vector<1x16x32xf32> to vector<16x32xf32>
    %cst_164 = arith.constant dense<0.000000e+00> : vector<16x32xf32>
    %364 = tpu.matmul %361, %363, %cst_164 {dimension_numbers = #tpu.dot_dimension_numbers<[1], [0], [0], [1], [0, 0, 1, 1], [], []>} : vector<16x16xf32>, vector<16x32xf32>, vector<16x32xf32> -> vector<16x32xf32>
    %365 = arith.addf %302, %364 : vector<16x32xf32>
    %366 = arith.addf %210, %365 : vector<16x32xf32>
    %367 = vector.extract_strided_slice %216 {offsets = [0, 0], sizes = [1, 32], strides = [1, 1]} : vector<2x32xf32> to vector<1x32xf32>
    %368 = vector.broadcast %367 : vector<1x32xf32> to vector<16x32xf32>
    %369 = arith.addf %366, %368 : vector<16x32xf32>
    %370 = vector.extract_strided_slice %212 {offsets = [2, 0], sizes = [1, 32], strides = [1, 1]} : vector<4x32xf32> to vector<1x32xf32>
    %371 = vector.extract_strided_slice %212 {offsets = [3, 0], sizes = [1, 32], strides = [1, 1]} : vector<4x32xf32> to vector<1x32xf32>
    %cst_165 = arith.constant dense<0.000000e+00> : vector<16xf32>
    %372 = vector.multi_reduction <add>, %369, %cst_165 [1] : vector<16x32xf32> to vector<16xf32>
    %373 = vector.shape_cast %372 : vector<16xf32> to vector<16x1xf32>
    %cst_166 = arith.constant 3.200000e+01 : f32
    %374 = vector.broadcast %cst_166 : f32 to vector<16x1xf32>
    %375 = arith.divf %373, %374 : vector<16x1xf32>
    %376 = vector.broadcast %375 : vector<16x1xf32> to vector<16x32xf32>
    %377 = arith.subf %369, %376 : vector<16x32xf32>
    %378 = arith.mulf %377, %377 : vector<16x32xf32>
    %cst_167 = arith.constant dense<0.000000e+00> : vector<16xf32>
    %379 = vector.multi_reduction <add>, %378, %cst_167 [1] : vector<16x32xf32> to vector<16xf32>
    %380 = vector.shape_cast %379 : vector<16xf32> to vector<16x1xf32>
    %cst_168 = arith.constant 3.200000e+01 : f32
    %381 = vector.broadcast %cst_168 : f32 to vector<16x1xf32>
    %382 = arith.divf %380, %381 : vector<16x1xf32>
    %383 = vector.broadcast %375 : vector<16x1xf32> to vector<16x32xf32>
    %384 = arith.subf %369, %383 : vector<16x32xf32>
    %cst_169 = arith.constant 9.99999974E-6 : f32
    %385 = vector.broadcast %cst_169 : f32 to vector<16x1xf32>
    %386 = arith.addf %382, %385 : vector<16x1xf32>
    %387 = math.rsqrt %386 : vector<16x1xf32>
    %388 = vector.broadcast %387 : vector<16x1xf32> to vector<16x32xf32>
    %389 = arith.mulf %384, %388 : vector<16x32xf32>
    %390 = vector.broadcast %370 : vector<1x32xf32> to vector<16x32xf32>
    %391 = arith.mulf %389, %390 : vector<16x32xf32>
    %392 = vector.broadcast %371 : vector<1x32xf32> to vector<16x32xf32>
    %393 = arith.addf %391, %392 : vector<16x32xf32>
    %c1_170 = arith.constant 1 : index
    %c0_171 = arith.constant 0 : index
    %c0_172 = arith.constant 0 : index
    %394 = vector.load %arg4[%c1_170, %c0_171, %c0_172] : memref<2x32x128xf32, #tpu.memory_space<vmem>>, vector<1x32x128xf32>
    %395 = vector.shape_cast %394 : vector<1x32x128xf32> to vector<32x128xf32>
    %cst_173 = arith.constant dense<0.000000e+00> : vector<16x128xf32>
    %396 = tpu.matmul %393, %395, %cst_173 {dimension_numbers = #tpu.dot_dimension_numbers<[1], [0], [0], [1], [0, 0, 1, 1], [], []>} : vector<16x32xf32>, vector<32x128xf32>, vector<16x128xf32> -> vector<16x128xf32>
    %c1_174 = arith.constant 1 : index
    %c0_175 = arith.constant 0 : index
    %c0_176 = arith.constant 0 : index
    %397 = vector.load %arg9[%c1_174, %c0_175, %c0_176] : memref<2x1x128xf32, #tpu.memory_space<vmem>>, vector<1x1x128xf32>
    %398 = vector.shape_cast %397 : vector<1x1x128xf32> to vector<1x128xf32>
    %399 = vector.broadcast %398 : vector<1x128xf32> to vector<16x128xf32>
    %400 = arith.addf %396, %399 : vector<16x128xf32>
    %cst_177 = arith.constant 5.000000e-01 : f32
    %401 = vector.broadcast %cst_177 : f32 to vector<16x128xf32>
    %402 = arith.mulf %401, %400 : vector<16x128xf32>
    %cst_178 = arith.constant 4.471500e-02 : f32
    %403 = vector.broadcast %cst_178 : f32 to vector<16x128xf32>
    %404 = arith.mulf %403, %400 : vector<16x128xf32>
    %405 = arith.mulf %404, %400 : vector<16x128xf32>
    %406 = arith.mulf %405, %400 : vector<16x128xf32>
    %407 = arith.addf %400, %406 : vector<16x128xf32>
    %cst_179 = arith.constant 0.797884583 : f32
    %408 = vector.broadcast %cst_179 : f32 to vector<16x128xf32>
    %409 = arith.mulf %408, %407 : vector<16x128xf32>
    %410 = math.tanh %409 : vector<16x128xf32>
    %cst_180 = arith.constant 1.000000e+00 : f32
    %411 = vector.broadcast %cst_180 : f32 to vector<16x128xf32>
    %412 = arith.addf %411, %410 : vector<16x128xf32>
    %413 = arith.mulf %402, %412 : vector<16x128xf32>
    %c1_181 = arith.constant 1 : index
    %c0_182 = arith.constant 0 : index
    %c0_183 = arith.constant 0 : index
    %414 = vector.load %arg5[%c1_181, %c0_182, %c0_183] : memref<2x128x32xf32, #tpu.memory_space<vmem>>, vector<1x128x32xf32>
    %415 = vector.shape_cast %414 : vector<1x128x32xf32> to vector<128x32xf32>
    %cst_184 = arith.constant dense<0.000000e+00> : vector<16x32xf32>
    %416 = tpu.matmul %413, %415, %cst_184 {dimension_numbers = #tpu.dot_dimension_numbers<[1], [0], [0], [1], [0, 0, 1, 1], [], []>} : vector<16x128xf32>, vector<128x32xf32>, vector<16x32xf32> -> vector<16x32xf32>
    %417 = vector.extract_strided_slice %216 {offsets = [1, 0], sizes = [1, 32], strides = [1, 1]} : vector<2x32xf32> to vector<1x32xf32>
    %418 = vector.broadcast %417 : vector<1x32xf32> to vector<16x32xf32>
    %419 = arith.addf %416, %418 : vector<16x32xf32>
    %420 = arith.addf %369, %419 : vector<16x32xf32>
    %c0_185 = arith.constant 0 : index
    %c0_186 = arith.constant 0 : index
    %421 = vector.load %arg10[%c0_185, %c0_186] : memref<2x32xf32, #tpu.memory_space<vmem>>, vector<2x32xf32>
    %422 = vector.extract_strided_slice %420 {offsets = [7, 0], sizes = [1, 32], strides = [1, 1]} : vector<16x32xf32> to vector<1x32xf32>
    %423 = vector.extract_strided_slice %420 {offsets = [15, 0], sizes = [1, 32], strides = [1, 1]} : vector<16x32xf32> to vector<1x32xf32>
    %424 = tpu.concatenate %422, %423 in 0 : vector<1x32xf32>, vector<1x32xf32> -> vector<2x32xf32>
    %425 = vector.extract_strided_slice %421 {offsets = [0, 0], sizes = [1, 32], strides = [1, 1]} : vector<2x32xf32> to vector<1x32xf32>
    %426 = vector.extract_strided_slice %421 {offsets = [1, 0], sizes = [1, 32], strides = [1, 1]} : vector<2x32xf32> to vector<1x32xf32>
    %cst_187 = arith.constant dense<0.000000e+00> : vector<2xf32>
    %427 = vector.multi_reduction <add>, %424, %cst_187 [1] : vector<2x32xf32> to vector<2xf32>
    %428 = vector.shape_cast %427 : vector<2xf32> to vector<2x1xf32>
    %cst_188 = arith.constant 3.200000e+01 : f32
    %429 = vector.broadcast %cst_188 : f32 to vector<2x1xf32>
    %430 = arith.divf %428, %429 : vector<2x1xf32>
    %431 = vector.broadcast %430 : vector<2x1xf32> to vector<2x32xf32>
    %432 = arith.subf %424, %431 : vector<2x32xf32>
    %433 = arith.mulf %432, %432 : vector<2x32xf32>
    %cst_189 = arith.constant dense<0.000000e+00> : vector<2xf32>
    %434 = vector.multi_reduction <add>, %433, %cst_189 [1] : vector<2x32xf32> to vector<2xf32>
    %435 = vector.shape_cast %434 : vector<2xf32> to vector<2x1xf32>
    %cst_190 = arith.constant 3.200000e+01 : f32
    %436 = vector.broadcast %cst_190 : f32 to vector<2x1xf32>
    %437 = arith.divf %435, %436 : vector<2x1xf32>
    %438 = vector.broadcast %430 : vector<2x1xf32> to vector<2x32xf32>
    %439 = arith.subf %424, %438 : vector<2x32xf32>
    %cst_191 = arith.constant 9.99999974E-6 : f32
    %440 = vector.broadcast %cst_191 : f32 to vector<2x1xf32>
    %441 = arith.addf %437, %440 : vector<2x1xf32>
    %442 = math.rsqrt %441 : vector<2x1xf32>
    %443 = vector.broadcast %442 : vector<2x1xf32> to vector<2x32xf32>
    %444 = arith.mulf %439, %443 : vector<2x32xf32>
    %445 = vector.broadcast %425 : vector<1x32xf32> to vector<2x32xf32>
    %446 = arith.mulf %444, %445 : vector<2x32xf32>
    %447 = vector.broadcast %426 : vector<1x32xf32> to vector<2x32xf32>
    %448 = arith.addf %446, %447 : vector<2x32xf32>
    %c0_192 = arith.constant 0 : index
    %c0_193 = arith.constant 0 : index
    %449 = vector.load %arg11[%c0_192, %c0_193] : memref<32x2xf32, #tpu.memory_space<vmem>>, vector<32x2xf32>
    %cst_194 = arith.constant dense<0.000000e+00> : vector<2x2xf32>
    %450 = tpu.matmul %448, %449, %cst_194 {dimension_numbers = #tpu.dot_dimension_numbers<[1], [0], [0], [1], [0, 0, 1, 1], [], []>} : vector<2x32xf32>, vector<32x2xf32>, vector<2x2xf32> -> vector<2x2xf32>
    %c0_195 = arith.constant 0 : index
    %c0_196 = arith.constant 0 : index
    %451 = vector.load %arg12[%c0_195, %c0_196] : memref<1x2xf32, #tpu.memory_space<vmem>>, vector<1x2xf32>
    %452 = vector.broadcast %451 : vector<1x2xf32> to vector<2x2xf32>
    %453 = arith.addf %450, %452 : vector<2x2xf32>
    %c0_197 = arith.constant 0 : index
    %c0_198 = arith.constant 0 : index
    %454 = vector.load %arg13[%c0_197, %c0_198] : memref<2x2xf32, #tpu.memory_space<vmem>>, vector<2x2xf32>
    tpu.vector_store %arg13[%c0_197, %c0_198], %453 {strides = array<i32>} : memref<2x2xf32, #tpu.memory_space<vmem>>, vector<2x2xf32>,
    return
  }
}

</mosaic_0001>

<bundles_post_ra>
// kernel: gpt_for_cls.1
= control target key start
LH: loop header
LB: loop body
LE: loop exit
PB: predicated region body
PF: predicated region fallthrough
CT: control target
= control target key end

     0   :  { %vm50_vm0 = vcmask 261120   ;;  %s4932_s0 = inlined_call_operand.vmem [shape: f32[16,32], index: 0, kind: input, shape index: {}]   ;;  %s4933_s1 = inlined_call_operand.vmem [shape: f32[2,8,8], index: 1, kind: input, shape index: {}]   ;;  %s4934_s2 = inlined_call_operand.vmem [shape: f32[12,32,16], index: 2, kind: input, shape index: {}]   ;;  %s4935_s3 = inlined_call_operand.vmem [shape: f32[4,16,32], index: 3, kind: input, shape index: {}]   ;;  %s4936_s4 = inlined_call_operand.vmem [shape: f32[2,32,128], index: 4, kind: input, shape index: {}]   ;;  %s4937_s5 = inlined_call_operand.vmem [shape: f32[2,128,32], index: 5, kind: input, shape index: {}]   ;;  %s4938_s6 = inlined_call_operand.vmem [shape: f32[2,4,32], index: 6, kind: input, shape index: {}]   ;;  %s4939_s7 = inlined_call_operand.vmem [shape: f32[2,6,16], index: 7, kind: input, shape index: {}]   ;;  %s4940_s8 = inlined_call_operand.vmem [shape: f32[2,2,32], index: 8, kind: input, shape index: {}]   ;;  %s4941_s9 = inlined_call_operand.vmem [shape: f32[2,1,128], index: 9, kind: input, shape index: {}]   ;;  %s4942_s10 = inlined_call_operand.vmem [shape: f32[2,32], index: 10, kind: input, shape index: {}]   ;;  %s4943_s11 = inlined_call_operand.vmem [shape: f32[32,2], index: 11, kind: input, shape index: {}]   ;;  %s4944_s12 = inlined_call_operand.vmem [shape: f32[1,2], index: 12, kind: input, shape index: {}]   ;;  %s4945_s13 = inlined_call_operand.hbm [shape: f32[2,2], index: 13, kind: output, shape index: {}]  }
   0x1   :  { %v4245_v0 = vld [vmem:[%s4932_s0] sm:$0xff]  ;;  %v4250_v1 = vld [vmem:[%s4932_s0 + $0x8] sm:$0xff] }
   0x2   :  { %18 = vsyncpa [#allocation3], 0  ;;  %v51_v2 = vsel %vm50_vm0, %v4245_v0, 0.0  ;;  %v54_v3 = vsel %vm50_vm0, %v4250_v1, 0.0  ;;  %v93_v14 = vld [vmem:[%s4934_s2 + $0x18] sm:$0xff]  ;;  %v92_v15 = vld [vmem:[%s4934_s2 + $0x10] sm:$0xff]  ;;  %v78_v23 = vlaneseq }
   0x3   :  { %52 = vadd.xlane.f32.xlu0 %v51_v2  ;;  %3743 = vmatprep.subr.mxu0 %v93_v14  ;;  %v91_v16 = vld [vmem:[%s4934_s2 + $0x8] sm:$0xff]  ;;  %v90_v17 = vld [vmem:[%s4934_s2] sm:$0xff]  ;;  %v3434_v18 = vld [vmem:[%s4934_s2 + $0x58] sm:$0xff]  ;;  %v4169_v47 = vmov 0.0   ;;  %vm4170_vm1 = vmmov 0   ;;  %vm347_vm2 = vcmask 130048  }
   0x4   :  { %3744 = vmatpush3.msra.mxu0 %v93_v14  ;;  %v4275_v26 = vshrl.u32 %v78_v23, 7  ;;  %v4283_v28 = vld [vmem:[%s4938_s6] sm:$0xf]  ;;  %v3433_v40 = vld [vmem:[%s4934_s2 + $0x50] sm:$0xff]  ;;  %v3432_v41 = vld [vmem:[%s4934_s2 + $0x48] sm:$0xff]  ;;  %3776 = vmatprep.subr.mxu1 %v4169_v47  ;;  %vm427_vm3 = vcmask 64512  }
   0x5   :  { %3745 = vmatprep.subr.mxu0 %v92_v15  ;;  %v3431_v42 = vld [vmem:[%s4934_s2 + $0x40] sm:$0xff]  ;;  %v3438_v43 = vld [vmem:[%s4934_s2 + $0x98] sm:$0xff]  ;;  %v3437_v44 = vld [vmem:[%s4934_s2 + $0x90] sm:$0xff]  ;;  %3778 = vmatprep.mubr.msk.f32.mxu1 %vm4170_vm1, %v4169_v47  ;;  %vm3305_vm4 = vcmask 1040384   ;;  %vm3307_vm5 = vcmask 254976   ;;  %vm3415_vm6 = vcmask 9216  }
   0x6   :  { %3746 = vmatpush3.msra.mxu0 %v92_v15  ;;  %v4278_v27 = vsub.s32 0, %v4275_v26  ;;  %v4286_v29 = vsub.s32 1, %v4275_v26  ;;  %v3436_v45 = vld [vmem:[%s4934_s2 + $0x88] sm:$0xff]  ;;  %v3435_v46 = vld [vmem:[%s4934_s2 + $0x80] sm:$0xff]  ;;  %v4336_v48 = vsub.s32 2, %v4275_v26  ;;  %v3455_v56 = vld [vmem:[%s4934_s2 + $0x38] sm:$0xff] }
   0x7   :  { %55 = vadd.xlane.f32.xlu0 %v54_v3  ;;  %3747 = vmatprep.subr.mxu0 %v91_v16  ;;  %v4341_v50 = vld [vmem:[%s4939_s7] sm:$0x3f]  ;;  %v270_v57 = vsub.s32 4, %v4275_v26  ;;  %v3454_v62 = vld [vmem:[%s4934_s2 + $0x30] sm:$0xff]  ;;  %v3453_v2 = vld [vmem:[%s4934_s2 + $0x28] sm:$0xff] }
   0x8   :  { %3748 = vmatpush3.msra.mxu0 %v91_v16  ;;  %v81_v30 = vrot.slane %v4283_v28, %v4278_v27  ;;  %v87_v33 = vrot.slane %v4283_v28, %v4286_v29  ;;  %v192_v51 = vrot.slane %v4341_v50, %v4336_v48  ;;  %v107_v53 = vrot.slane %v4341_v50, %v4278_v27 }
   0x9   :  { %3749 = vmatprep.subr.mxu0 %v90_v17  ;;  %v271_v61 = vrot.slane %v4341_v50, %v270_v57 }
   0xa   :  { %3750 = vmatpush3.msra.mxu0 %v90_v17  ;;  %v4404_v17 = vld [vmem:[%s4933_s1] sm:$0xff] }
   0xb   :  { %3754 = vmatprep.subr.mxu0 %v3434_v18 }
  0x8c   :  { %v53_v4 = vpop.xlane.xlu0 %52 }
  0x8d   :  { %v58_v5 = vmul.f32 0.03125, %v53_v4 }
  0x8f   :  { %v60_v6 = vsub.f32 %v4245_v0, %v58_v5  ;;  %v3452_v5 = vld [vmem:[%s4934_s2 + $0x20] sm:$0xff] }
  0x90   :  { %v56_v7 = vpop.xlane.xlu0 %55 }
  0x91   :  { %v59_v8 = vmul.f32 0.03125, %v56_v7  ;;  %v62_v9 = vmul.f32 %v60_v6, %v60_v6 }
  0x93   :  { %v61_v10 = vsub.f32 %v4250_v1, %v59_v8  ;;  %v64_v11 = vsel %vm50_vm0, %v62_v9, 0.0  ;;  %v3463_v8 = vld [vmem:[%s4934_s2 + $0xb8] sm:$0xff]  ;;  %v3462_v9 = vld [vmem:[%s4934_s2 + $0xb0] sm:$0xff] }
  0x94   :  { %65 = vadd.xlane.f32.xlu1 %v64_v11  ;;  %v3460_v11 = vld [vmem:[%s4934_s2 + $0xa0] sm:$0xff] }
  0x95   :  { %v63_v12 = vmul.f32 %v61_v10, %v61_v10 }
  0x97   :  { %v67_v13 = vsel %vm50_vm0, %v63_v12, 0.0 }
  0x98   :  { %68 = vadd.xlane.f32.xlu1 %v67_v13  ;;  %v4399_v13 = vld [vmem:[%s4933_s1 + $0x8] sm:$0xff] }
 0x11d   :  { %v66_v19 = vpop.xlane.xlu1 %65 }
 0x11e   :  { %v70_v20 = vmul.f32 0.03125, %v66_v19 }
 0x120   :  { %v72_v21 = vadd.f32 1e-05, %v70_v20 }
 0x121   :  { %v69_v22 = vpop.xlane.xlu1 %68 }
 0x122   :  { %4089 = vrsqrt.f32 %v72_v21  ;;  %v71_v24 = vmul.f32 0.03125, %v69_v22 }
 0x124   :  { %v73_v25 = vadd.f32 1e-05, %v71_v24  ;;  %v853_v24 = vsub.s32 5, %v4275_v26 }
 0x126   :  { %4091 = vrsqrt.f32 %v73_v25 }
 0x12f   :  { %v4090_v31 = vpop.eup %4089 }
 0x130   :  { %v76_v32 = vmul.f32 %v4090_v31, %v60_v6 }
 0x132   :  { %v82_v34 = vmul.f32 %v81_v30, %v76_v32 }
 0x133   :  { %v4092_v35 = vpop.eup %4091 }
 0x134   :  { %v77_v36 = vmul.f32 %v4092_v35, %v61_v10  ;;  %v4292_v37 = vadd.f32 %v87_v33, %v82_v34  ;;  %v3461_v10 = vld [vmem:[%s4934_s2 + $0xa8] sm:$0xff] }
 0x136   :  { %v83_v38 = vmul.f32 %v81_v30, %v77_v36  ;;  %3751 = vmatprep.mubr.msk.f32.mxu0 %vm50_vm0, %v4292_v37  ;;  %v4414_v30 = vrot.slane %v4341_v50, %v853_v24 }
 0x138   :  { %v4296_v39 = vadd.f32 %v87_v33, %v83_v38 }
 0x13a   :  { %3752 = vmatmul.mubr.msk.f32.vlgmr.msra.gmra.mxu0 %vm50_vm0, %v4296_v39 }
 0x13b   :  { %3755 = vmatpush3.msra.mxu0 %v3434_v18  ;;  %3762 = vmatprep.mubr.msk.f32.mxu0 %vm50_vm0, %v4292_v37 }
 0x13c   :  { %3756 = vmatprep.subr.mxu0 %v3433_v40 }
 0x13d   :  { %3757 = vmatpush3.msra.mxu0 %v3433_v40 }
 0x13e   :  { %3758 = vmatprep.subr.mxu0 %v3432_v41 }
 0x13f   :  { %3759 = vmatpush3.msra.mxu0 %v3432_v41 }
 0x140   :  { %3760 = vmatprep.subr.mxu0 %v3431_v42 }
 0x141   :  { %3761 = vmatpush3.msra.mxu0 %v3431_v42 }
 0x142   :  { %3763 = vmatmul.mubr.msk.f32.vlgmr.msra.gmra.mxu0 %vm50_vm0, %v4296_v39  ;;  %3765 = vmatprep.subr.mxu0 %v3438_v43 }
 0x143   :  { %3766 = vmatpush3.msra.mxu0 %v3438_v43  ;;  %3773 = vmatprep.mubr.msk.f32.mxu0 %vm50_vm0, %v4292_v37 }
 0x144   :  { %3767 = vmatprep.subr.mxu0 %v3437_v44 }
 0x145   :  { %3768 = vmatpush3.msra.mxu0 %v3437_v44 }
 0x146   :  { %3769 = vmatprep.subr.mxu0 %v3436_v45 }
 0x147   :  { %3770 = vmatpush3.msra.mxu0 %v3436_v45 }
 0x148   :  { %3771 = vmatprep.subr.mxu0 %v3435_v46 }
 0x149   :  { %3772 = vmatpush3.msra.mxu0 %v3435_v46 }
 0x14a   :  { %3774 = vmatmul.mubr.msk.f32.vlgmr.msra.gmra.mxu0 %vm50_vm0, %v4296_v39  ;;  %3786 = vmatprep.subr.mxu0 %v4169_v47 }
 0x14b   :  { %3788 = vmatprep.mubr.msk.f32.mxu0 %vm4170_vm1, %v4169_v47 }
 0x1fa   :  { %v3753_v49 = vpop.f32.mrf.mxu0 }
 0x1fb   :  { %v186_v60 = vadd.f32 %v3753_v49, %v107_v53 }
 0x1fc   :  { %v180_v52 = vpop.f32.mrf.mxu0 }
 0x1fd   :  { %v181_v63 = vadd.f32 %v180_v52, %v107_v53 }
 0x202   :  { %v3764_v54 = vpop.f32.mrf.mxu0 }
 0x203   :  { %v265_v55 = vadd.f32 %v3764_v54, %v192_v51  ;;  %v3459_v54 = vld [vmem:[%s4934_s2 + $0x78] sm:$0xff] }
 0x204   :  { %v259_v58 = vpop.f32.mrf.mxu0 }
 0x205   :  { %v260_v59 = vadd.f32 %v259_v58, %v192_v51  ;;  %3787 = vmatpush3.xpose.msk.msra.mxu0 %vm347_vm2, %v265_v55  ;;  %v3457_v58 = vld [vmem:[%s4934_s2 + $0x68] sm:$0xff] }
 0x206   :  { %3796 = vmatprep.subr.mxu0 %v3455_v56 }
 0x207   :  { %3777 = vmatpush3.xpose.msk.msra.mxu1 %vm347_vm2, %v260_v59  ;;  %v3456_v59 = vld [vmem:[%s4934_s2 + $0x60] sm:$0xff] }
 0x208   :  { %3789 = vmatmul.mubr.msk.f32.vlgmr.msra.gmra.mxu0 %vm347_vm2, %v186_v60  ;;  %3781 = vmatprep.subr.mxu1 %v4169_v47 }
 0x209   :  { %3797 = vmatpush3.msra.mxu0 %v3455_v56  ;;  %3804 = vmatprep.mubr.msk.f32.mxu0 %vm50_vm0, %v4292_v37  ;;  %v3458_v56 = vld [vmem:[%s4934_s2 + $0x70] sm:$0xff] }
 0x20a   :  { %v3775_v3 = vpop.f32.mrf.mxu0  ;;  %3779 = vmatmul.mubr.msk.f32.vlgmr.msra.gmra.mxu1 %vm347_vm2, %v181_v63  ;;  %3798 = vmatprep.subr.mxu0 %v3454_v62 }
 0x20b   :  { %v4367_v4 = vadd.f32 %v3775_v3, %v271_v61  ;;  %3799 = vmatpush3.msra.mxu0 %v3454_v62  ;;  %3783 = vmatprep.mubr.msk.f32.mxu1 %vm4170_vm1, %v4169_v47  ;;  %v4450_v62 = vsub.s32 3, %v4275_v26 }
 0x20c   :  { %v338_v6 = vpop.f32.mrf.mxu0  ;;  %3800 = vmatprep.subr.mxu0 %v3453_v2 }
 0x20d   :  { %v339_v7 = vadd.f32 %v338_v6, %v271_v61  ;;  %3801 = vmatpush3.msra.mxu0 %v3453_v2  ;;  %v775_v2 = vrot.slane %v4341_v50, %v4450_v62 }
 0x20e   :  { %3802 = vmatprep.subr.mxu0 %v3452_v5 }
 0x20f   :  { %3782 = vmatpush3.msra.mxu1 %v339_v7  ;;  %3803 = vmatpush3.msra.mxu0 %v3452_v5 }
 0x210   :  { %3805 = vmatmul.mubr.msk.f32.vlgmr.msra.gmra.mxu0 %vm50_vm0, %v4296_v39  ;;  %3818 = vmatprep.subr.mxu0 %v3463_v8 }
 0x211   :  { %3819 = vmatpush3.msra.mxu0 %v3463_v8  ;;  %3826 = vmatprep.mubr.msk.f32.mxu0 %vm50_vm0, %v4292_v37 }
 0x212   :  { %3820 = vmatprep.subr.mxu0 %v3462_v9  ;;  %3791 = vmatprep.subr.mxu1 %v4169_v47 }
 0x213   :  { %3821 = vmatpush3.msra.mxu0 %v3462_v9 }
 0x214   :  { %3822 = vmatprep.subr.mxu0 %v3461_v10 }
 0x215   :  { %3823 = vmatpush3.msra.mxu0 %v3461_v10 }
 0x216   :  { %3824 = vmatprep.subr.mxu0 %v3460_v11 }
 0x217   :  { %3825 = vmatpush3.msra.mxu0 %v3460_v11 }
 0x218   :  { %3827 = vmatmul.mubr.msk.f32.vlgmr.msra.gmra.mxu0 %vm50_vm0, %v4296_v39  ;;  %3839 = vmatprep.subr.mxu0 %v4169_v47 }
 0x219   :  { %3841 = vmatprep.mubr.msk.f32.mxu0 %vm4170_vm1, %v4169_v47 }
 0x2c8   :  { %v584_v12 = vpop.f32.mrf.mxu0 }
 0x2c9   :  { %v588_v14 = vmul.f32 0.25, %v584_v12 }
 0x2ca   :  { %v420_v15 = vpop.f32.mrf.mxu1  ;;  %v3790_v16 = vpop.f32.mrf.mxu0 }
 0x2cb   :  { %v424_v18 = vmul.f32 0.25, %v420_v15  ;;  %v591_v19 = vadd.f32 %v4399_v13, %v588_v14 }
 0x2cc   :  { %v3780_v20 = vpop.f32.mrf.mxu1 }
 0x2cd   :  { %v592_v21 = vsel %vm427_vm3, %v591_v19, -inf  ;;  %v426_v22 = vadd.f32 %v4404_v17, %v424_v18 }
 0x2ce   :  { %593 = vmax.xlane.f32.xlu1 %v592_v21 }
 0x2cf   :  { %v428_v23 = vsel %vm427_vm3, %v426_v22, -inf }
 0x2d0   :  { %429 = vmax.xlane.f32.xlu0 %v428_v23  ;;  %v3806_v25 = vpop.f32.mrf.mxu0 }
 0x2d2   :  { %v763_v31 = vpop.f32.mrf.mxu0 }
 0x2d8   :  { %v3828_v32 = vpop.f32.mrf.mxu0 }
 0x2d9   :  { %v4417_v33 = vadd.f32 %v3828_v32, %v4414_v30 }
 0x2da   :  { %v921_v8 = vpop.f32.mrf.mxu0 }
 0x2db   :  { %v922_v10 = vadd.f32 %v921_v8, %v4414_v30 }
 0x357   :  { %v594_v34 = vpop.xlane.xlu1 %593 }
 0x358   :  { %v595_v35 = vsub.f32 %v591_v19, %v594_v34 }
 0x359   :  { %v430_v36 = vpop.xlane.xlu0 %429 }
 0x35a   :  { %v596_v38 = vmul.f32 1.442695, %v595_v35  ;;  %v431_v40 = vsub.f32 %v426_v22, %v430_v36 }
 0x35c   :  { %4093 = vpow2.f32 %v596_v38  ;;  %v432_v41 = vmul.f32 1.442695, %v431_v40 }
 0x35e   :  { %4095 = vpow2.f32 %v432_v41 }
 0x369   :  { %v4094_v42 = vpop.eup %4093 }
 0x36a   :  { %v598_v43 = vsel %vm427_vm3, %v4094_v42, 0.0 }
 0x36b   :  { %v4096_v44 = vpop.eup %4095  ;;  %599 = vadd.xlane.f32.xlu1 %v598_v43 }
 0x36c   :  { %v434_v45 = vsel %vm427_vm3, %v4096_v44, 0.0 }
 0x36d   :  { %435 = vadd.xlane.f32.xlu0 %v434_v45  ;;  %v677_v45 = vld [vmem:[%s4935_s3 + $0x8] sm:$0xff] }
 0x3f4   :  { %v600_v46 = vpop.xlane.xlu1 %599 }
 0x3f6   :  { %v436_v49 = vpop.xlane.xlu0 %435 }
 0x3f7   :  { %4097 = vrcp.f32 %v436_v49  ;;  %v676_v49 = vld [vmem:[%s4935_s3] sm:$0xff] }
 0x3f8   :  { %4099 = vrcp.f32 %v600_v46 }
 0x404   :  { %v4098_v51 = vpop.eup %4097 }
 0x405   :  { %v438_v52 = vmul.f32 %v4098_v51, %v4096_v44  ;;  %v4100_v53 = vpop.eup %4099  ;;  %v3476_v51 = vld [vmem:[%s4935_s3 + $0x10] sm:$0xff] }
 0x406   :  { %v602_v55 = vmul.f32 %v4100_v53, %v4094_v42 }
 0x407   :  { %3784 = vmatmul.mubr.msk.f32.vlgmr.msra.gmra.mxu1 %vm427_vm3, %v438_v52 }
 0x408   :  { %3792 = vmatpush3.msra.mxu1 %v4367_v4  ;;  %3793 = vmatprep.mubr.msk.f32.mxu1 %vm4170_vm1, %v4169_v47 }
 0x409   :  { %3807 = vmatprep.subr.mxu1 %v3459_v54 }
 0x40b   :  { %3794 = vmatmul.mubr.msk.f32.vlgmr.msra.gmra.mxu1 %vm427_vm3, %v602_v55 }
 0x40c   :  { %3808 = vmatpush3.msra.mxu1 %v3459_v54  ;;  %3815 = vmatprep.mubr.msk.f32.mxu1 %vm50_vm0, %v4292_v37 }
 0x40d   :  { %3809 = vmatprep.subr.mxu1 %v3458_v56 }
 0x40e   :  { %3810 = vmatpush3.msra.mxu1 %v3458_v56 }
 0x40f   :  { %3811 = vmatprep.subr.mxu1 %v3457_v58 }
 0x410   :  { %3812 = vmatpush3.msra.mxu1 %v3457_v58  ;;  %v4497_v58 = vld [vmem:[%s4940_s8] sm:$0x3] }
 0x411   :  { %3813 = vmatprep.subr.mxu1 %v3456_v59 }
 0x412   :  { %3814 = vmatpush3.msra.mxu1 %v3456_v59 }
 0x413   :  { %3816 = vmatmul.mubr.msk.f32.vlgmr.msra.gmra.mxu1 %vm50_vm0, %v4296_v39  ;;  %3829 = vmatprep.subr.mxu1 %v4169_v47  ;;  %v696_v39 = vrot.slane %v4341_v50, %v4286_v29 }
 0x414   :  { %3831 = vmatprep.mubr.msk.f32.mxu1 %vm4170_vm1, %v4169_v47 }
 0x415   :  { %v769_v7 = vadd.f32 %v3806_v25, %v696_v39  ;;  %v764_v9 = vadd.f32 %v763_v31, %v696_v39 }
 0x4c7   :  { %v4445_v37 = vpop.f32.mrf.mxu1 }
 0x4c9   :  { %v3785_v60 = vpop.f32.mrf.mxu1 }
 0x4ca   :  { %v1424_v60 = vrot.slane %v4497_v58, %v4278_v27 }
 0x4cb   :  { %v4447_v61 = vpop.f32.mrf.mxu1 }
 0x4cd   :  { %v3795_v63 = vpop.f32.mrf.mxu1 }
 0x4d3   :  { %v3817_v3 = vpop.f32.mrf.mxu1 }
 0x4d4   :  { %v848_v4 = vadd.f32 %v3817_v3, %v775_v2 }
 0x4d5   :  { %v842_v5 = vpop.f32.mrf.mxu1 }
 0x4d6   :  { %v843_v6 = vadd.f32 %v842_v5, %v775_v2  ;;  %3840 = vmatpush3.xpose.msk.msra.mxu0 %vm347_vm2, %v848_v4 }
 0x4d8   :  { %3830 = vmatpush3.xpose.msk.msra.mxu1 %vm347_vm2, %v843_v6 }
 0x4d9   :  { %3842 = vmatmul.mubr.msk.f32.vlgmr.msra.gmra.mxu0 %vm347_vm2, %v769_v7  ;;  %3834 = vmatprep.subr.mxu1 %v4169_v47 }
 0x4db   :  { %3832 = vmatmul.mubr.msk.f32.vlgmr.msra.gmra.mxu1 %vm347_vm2, %v764_v9 }
 0x4dc   :  { %3835 = vmatpush3.msra.mxu1 %v922_v10  ;;  %3836 = vmatprep.mubr.msk.f32.mxu1 %vm4170_vm1, %v4169_v47 }
 0x4dd   :  { %3844 = vmatprep.subr.mxu1 %v4169_v47 }
 0x599   :  { %v1164_v50 = vpop.f32.mrf.mxu0 }
 0x59a   :  { %v1168_v11 = vmul.f32 0.25, %v1164_v50 }
 0x59b   :  { %v1002_v12 = vpop.f32.mrf.mxu1  ;;  %v3843_v14 = vpop.f32.mrf.mxu0 }
 0x59c   :  { %v1006_v15 = vmul.f32 0.25, %v1002_v12  ;;  %v1169_v16 = vadd.f32 %v4399_v13, %v1168_v11 }
 0x59d   :  { %v3833_v18 = vpop.f32.mrf.mxu1 }
 0x59e   :  { %v1170_v19 = vsel %vm427_vm3, %v1169_v16, -inf  ;;  %v1007_v20 = vadd.f32 %v1006_v15, %v4404_v17  ;;  %v1467_v18 = vld [vmem:[%s4936_s4 + $0x10] sm:$0xff] }
 0x59f   :  { %1171 = vmax.xlane.f32.xlu1 %v1170_v19  ;;  %v1466_v19 = vld [vmem:[%s4936_s4 + $0x8] sm:$0xff] }
 0x5a0   :  { %v1008_v21 = vsel %vm427_vm3, %v1007_v20, -inf }
 0x5a1   :  { %1009 = vmax.xlane.f32.xlu0 %v1008_v21 }
 0x628   :  { %v1172_v22 = vpop.xlane.xlu1 %1171 }
 0x629   :  { %v1173_v23 = vsub.f32 %v1169_v16, %v1172_v22  ;;  %v1468_v16 = vld [vmem:[%s4936_s4 + $0x18] sm:$0xff] }
 0x62a   :  { %v1010_v25 = vpop.xlane.xlu0 %1009 }
 0x62b   :  { %v1174_v30 = vmul.f32 1.442695, %v1173_v23  ;;  %v1011_v31 = vsub.f32 %v1007_v20, %v1010_v25  ;;  %v1465_v20 = vld [vmem:[%s4936_s4] sm:$0xff] }
 0x62d   :  { %4101 = vpow2.f32 %v1174_v30  ;;  %v1012_v32 = vmul.f32 1.442695, %v1011_v31 }
 0x62f   :  { %4103 = vpow2.f32 %v1012_v32 }
 0x63a   :  { %v4102_v34 = vpop.eup %4101 }
 0x63b   :  { %v1176_v35 = vsel %vm427_vm3, %v4102_v34, 0.0 }
 0x63c   :  { %v4104_v36 = vpop.eup %4103  ;;  %1177 = vadd.xlane.f32.xlu1 %v1176_v35 }
 0x63d   :  { %v1014_v38 = vsel %vm427_vm3, %v4104_v36, 0.0 }
 0x63e   :  { %1015 = vadd.xlane.f32.xlu0 %v1014_v38 }
 0x6c5   :  { %v1178_v40 = vpop.xlane.xlu1 %1177 }
 0x6c7   :  { %v1016_v41 = vpop.xlane.xlu0 %1015 }
 0x6c8   :  { %4105 = vrcp.f32 %v1016_v41  ;;  %v1462_v41 = vrot.slane %v4283_v28, %v4450_v62 }
 0x6c9   :  { %4107 = vrcp.f32 %v1178_v40 }
 0x6d5   :  { %v4106_v42 = vpop.eup %4105 }
 0x6d6   :  { %v1018_v43 = vmul.f32 %v4106_v42, %v4104_v36  ;;  %v4108_v44 = vpop.eup %4107 }
 0x6d7   :  { %v1180_v46 = vmul.f32 %v4108_v44, %v4102_v34  ;;  %v1456_v34 = vrot.slane %v4283_v28, %v4336_v48  ;;  %v1588_v28 = vld [vmem:[%s4937_s5 + $0x68] sm:$0xff] }
 0x6d8   :  { %3837 = vmatmul.mubr.msk.f32.vlgmr.msra.gmra.mxu1 %vm427_vm3, %v1018_v43 }
 0x6d9   :  { %3845 = vmatpush3.msra.mxu1 %v4417_v33  ;;  %3846 = vmatprep.mubr.msk.f32.mxu1 %vm4170_vm1, %v4169_v47  ;;  %v3477_v33 = vld [vmem:[%s4935_s3 + $0x18] sm:$0xff] }
 0x6da   :  { %3856 = vmatprep.subr.mxu1 %v677_v45  ;;  %3849 = vmatprep.subr.mxu0 %v3477_v33 }
 0x6db   :  { %3850 = vmatpush3.msra.mxu0 %v3477_v33  ;;  %v1586_v33 = vld [vmem:[%s4937_s5 + $0x58] sm:$0xff] }
 0x6dc   :  { %3847 = vmatmul.mubr.msk.f32.vlgmr.msra.gmra.mxu1 %vm427_vm3, %v1180_v46  ;;  %3851 = vmatprep.subr.mxu0 %v3476_v51  ;;  %v1589_v46 = vld [vmem:[%s4937_s5 + $0x70] sm:$0xff] }
 0x6dd   :  { %3857 = vmatpush3.msra.mxu1 %v677_v45  ;;  %3860 = vmatprep.mubr.msk.f32.mxu1 %vm347_vm2, %v4445_v37  ;;  %v1590_v45 = vld [vmem:[%s4937_s5 + $0x78] sm:$0xff] }
 0x6de   :  { %3858 = vmatprep.subr.mxu1 %v676_v49  ;;  %3852 = vmatpush3.msra.mxu0 %v3476_v51  ;;  %v1585_v51 = vld [vmem:[%s4937_s5 + $0x50] sm:$0xff] }
 0x6df   :  { %3859 = vmatpush3.msra.mxu1 %v676_v49  ;;  %3863 = vmatprep.subr.mxu0 %v1468_v16  ;;  %v1587_v49 = vld [vmem:[%s4937_s5 + $0x60] sm:$0xff] }
 0x6e0   :  { %3861 = vmatmul.mubr.msk.f32.vlgmr.msra.gmra.mxu1 %vm347_vm2, %v4447_v61  ;;  %3874 = vmatprep.subr.mxu1 %v1590_v45 }
 0x6e1   :  { %3875 = vmatpush3.msra.mxu1 %v1590_v45 }
 0x6e2   :  { %3876 = vmatprep.subr.mxu1 %v1589_v46 }
 0x6e3   :  { %3877 = vmatpush3.msra.mxu1 %v1589_v46 }
 0x6e4   :  { %3878 = vmatprep.subr.mxu1 %v1588_v28 }
 0x6e5   :  { %3879 = vmatpush3.msra.mxu1 %v1588_v28 }
 0x6e6   :  { %3880 = vmatprep.subr.mxu1 %v1587_v49 }
 0x6e7   :  { %3881 = vmatpush3.msra.mxu1 %v1587_v49 }
 0x6e8   :  { %3882 = vmatprep.subr.mxu1 %v1586_v33 }
 0x6e9   :  { %3883 = vmatpush3.msra.mxu1 %v1586_v33  ;;  %v3491_v33 = vld [vmem:[%s4934_s2 + $0xd8] sm:$0xff] }
 0x6ea   :  { %3884 = vmatprep.subr.mxu1 %v1585_v51 }
 0x6eb   :  { %3885 = vmatpush3.msra.mxu1 %v1585_v51  ;;  %v3490_v51 = vld [vmem:[%s4934_s2 + $0xd0] sm:$0xff] }
 0x798   :  { %v1088_v52 = vpop.f32.mrf.mxu1 }
 0x799   :  { %3853 = vmatprep.mubr.msk.f32.mxu0 %vm347_vm2, %v1088_v52  ;;  %v1584_v52 = vld [vmem:[%s4937_s5 + $0x48] sm:$0xff] }
 0x79a   :  { %v3838_v53 = vpop.f32.mrf.mxu1  ;;  %3886 = vmatprep.subr.mxu1 %v1584_v52 }
 0x79b   :  { %v1583_v53 = vld [vmem:[%s4937_s5 + $0x40] sm:$0xff]  ;;  %3887 = vmatpush3.msra.mxu1 %v1584_v52  ;;  %v3489_v52 = vld [vmem:[%s4934_s2 + $0xc8] sm:$0xff] }
 0x79c   :  { %v1250_v54 = vpop.f32.mrf.mxu1  ;;  %3888 = vmatprep.subr.mxu1 %v1583_v53 }
 0x79d   :  { %3854 = vmatmul.mubr.msk.f32.vlgmr.msra.gmra.mxu0 %vm347_vm2, %v1250_v54  ;;  %v1582_v54 = vld [vmem:[%s4937_s5 + $0x38] sm:$0xff]  ;;  %3889 = vmatpush3.msra.mxu1 %v1583_v53  ;;  %v3488_v53 = vld [vmem:[%s4934_s2 + $0xc0] sm:$0xff] }
 0x79e   :  { %v3848_v55 = vpop.f32.mrf.mxu1  ;;  %3864 = vmatpush3.msra.mxu0 %v1468_v16  ;;  %3890 = vmatprep.subr.mxu1 %v1582_v54 }
 0x79f   :  { %3865 = vmatprep.subr.mxu0 %v1467_v18  ;;  %v1581_v55 = vld [vmem:[%s4937_s5 + $0x30] sm:$0xff]  ;;  %3891 = vmatpush3.msra.mxu1 %v1582_v54  ;;  %v3495_v54 = vld [vmem:[%s4934_s2 + $0x118] sm:$0xff] }
 0x7a0   :  { %v3862_v56 = vpop.f32.mrf.mxu1  ;;  %3866 = vmatpush3.msra.mxu0 %v1467_v18  ;;  %3892 = vmatprep.subr.mxu1 %v1581_v55 }
 0x7a1   :  { %3867 = vmatprep.subr.mxu0 %v1466_v19  ;;  %3893 = vmatpush3.msra.mxu1 %v1581_v55 }
 0x7a2   :  { %v1410_v61 = vpop.f32.mrf.mxu1  ;;  %3868 = vmatpush3.msra.mxu0 %v1466_v19 }
 0x7a3   :  { %3869 = vmatprep.subr.mxu0 %v1465_v20 }
 0x7a4   :  { %3870 = vmatpush3.msra.mxu0 %v1465_v20 }
 0x7a5   :  { %3909 = vmatprep.subr.mxu0 %v3491_v33 }
 0x85d   :  { %v3855_v59 = vpop.f32.mrf.mxu0 }
 0x85e   :  { %v1416_v37 = vadd.f32 %v3862_v56, %v3855_v59  ;;  %v1580_v56 = vld [vmem:[%s4937_s5 + $0x28] sm:$0xff]  ;;  %v1579_v59 = vld [vmem:[%s4937_s5 + $0x20] sm:$0xff] }
 0x85f   :  { %v1329_v63 = vpop.f32.mrf.mxu0  ;;  %3894 = vmatprep.subr.mxu1 %v1580_v56 }
 0x860   :  { %v1420_v2 = vadd.f32 %v1416_v37, %v4250_v1  ;;  %v1411_v39 = vadd.f32 %v1410_v61, %v1329_v63  ;;  %3895 = vmatpush3.msra.mxu1 %v1580_v56  ;;  %v1578_v37 = vld [vmem:[%s4937_s5 + $0x18] sm:$0xff]  ;;  %v1576_v61 = vld [vmem:[%s4937_s5 + $0x8] sm:$0xff]  ;;  %v1575_v63 = vld [vmem:[%s4937_s5] sm:$0xff] }
 0x861   :  { %3896 = vmatprep.subr.mxu1 %v1579_v59 }
 0x862   :  { %v4502_v3 = vadd.f32 %v1424_v60, %v1420_v2  ;;  %v1419_v4 = vadd.f32 %v1411_v39, %v4245_v0  ;;  %3897 = vmatpush3.msra.mxu1 %v1579_v59  ;;  %v3482_v2 = vld [vmem:[%s4941_s9] ss:$0 sm:$0xff] }
 0x863   :  { %3898 = vmatprep.subr.mxu1 %v1578_v37 }
 0x864   :  { %v4505_v5 = vadd.f32 %v1424_v60, %v1419_v4  ;;  %v1430_v6 = vsel %vm50_vm0, %v4502_v3, 0.0  ;;  %v1577_v60 = vld [vmem:[%s4937_s5 + $0x10] sm:$0xff]  ;;  %3899 = vmatpush3.msra.mxu1 %v1578_v37 }
 0x865   :  { %1431 = vadd.xlane.f32.xlu1 %v1430_v6  ;;  %3900 = vmatprep.subr.mxu1 %v1577_v60 }
 0x866   :  { %v1427_v7 = vsel %vm50_vm0, %v4505_v5, 0.0  ;;  %3901 = vmatpush3.msra.mxu1 %v1577_v60 }
 0x867   :  { %1428 = vadd.xlane.f32.xlu0 %v1427_v7  ;;  %3902 = vmatprep.subr.mxu1 %v1576_v61 }
 0x868   :  { %3903 = vmatpush3.msra.mxu1 %v1576_v61 }
 0x869   :  { %3904 = vmatprep.subr.mxu1 %v1575_v63 }
 0x86a   :  { %3905 = vmatpush3.msra.mxu1 %v1575_v63  ;;  %v4621_v63 = vld [vmem:[%s4938_s6 + $0x4] sm:$0xf] }
 0x86b   :  { %3947 = vmatprep.subr.mxu1 %v4169_v47 }
 0x8ee   :  { %v1432_v8 = vpop.xlane.xlu1 %1431 }
 0x8ef   :  { %v1434_v9 = vmul.f32 0.03125, %v1432_v8 }
 0x8f0   :  { %v1429_v10 = vpop.xlane.xlu0 %1428 }
 0x8f1   :  { %v1436_v1 = vsub.f32 %v4502_v3, %v1434_v9  ;;  %v1433_v50 = vmul.f32 0.03125, %v1429_v10 }
 0x8f3   :  { %v1435_v11 = vsub.f32 %v4505_v5, %v1433_v50  ;;  %v1438_v12 = vmul.f32 %v1436_v1, %v1436_v1 }
 0x8f5   :  { %v1442_v0 = vsel %vm50_vm0, %v1438_v12, 0.0  ;;  %v1437_v14 = vmul.f32 %v1435_v11, %v1435_v11 }
 0x8f6   :  { %1443 = vadd.xlane.f32.xlu1 %v1442_v0 }
 0x8f7   :  { %v1439_v15 = vsel %vm50_vm0, %v1437_v14, 0.0 }
 0x8f8   :  { %1440 = vadd.xlane.f32.xlu0 %v1439_v15 }
 0x97f   :  { %v1444_v21 = vpop.xlane.xlu1 %1443 }
 0x980   :  { %v1446_v22 = vmul.f32 0.03125, %v1444_v21 }
 0x981   :  { %v1441_v23 = vpop.xlane.xlu0 %1440 }
 0x982   :  { %v1448_v25 = vadd.f32 1e-05, %v1446_v22  ;;  %v1445_v30 = vmul.f32 0.03125, %v1441_v23 }
 0x984   :  { %4109 = vrsqrt.f32 %v1448_v25  ;;  %v1447_v31 = vadd.f32 1e-05, %v1445_v30  ;;  %v1594_v30 = vrot.slane %v4497_v58, %v4286_v29 }
 0x986   :  { %4111 = vrsqrt.f32 %v1447_v31 }
 0x991   :  { %v4110_v32 = vpop.eup %4109 }
 0x992   :  { %v1452_v35 = vmul.f32 %v4110_v32, %v1436_v1 }
 0x993   :  { %v4112_v36 = vpop.eup %4111 }
 0x994   :  { %v1451_v38 = vmul.f32 %v4112_v36, %v1435_v11  ;;  %v1458_v40 = vmul.f32 %v1456_v34, %v1452_v35 }
 0x996   :  { %v1457_v42 = vmul.f32 %v1456_v34, %v1451_v38  ;;  %v1464_v44 = vadd.f32 %v1462_v41, %v1458_v40 }
 0x998   :  { %v1463_v43 = vadd.f32 %v1462_v41, %v1457_v42 }
 0x99a   :  { %3871 = vmatprep.mubr.msk.f32.mxu0 %vm50_vm0, %v1463_v43 }
 0x99b   :  { %3872 = vmatmul.mubr.msk.f32.vlgmr.msra.gmra.mxu0 %vm50_vm0, %v1464_v44 }
 0x99c   :  { %3910 = vmatpush3.msra.mxu0 %v3491_v33 }
 0x99d   :  { %3911 = vmatprep.subr.mxu0 %v3490_v51 }
 0x99e   :  { %3912 = vmatpush3.msra.mxu0 %v3490_v51 }
 0x99f   :  { %3913 = vmatprep.subr.mxu0 %v3489_v52 }
 0x9a0   :  { %3914 = vmatpush3.msra.mxu0 %v3489_v52 }
 0x9a1   :  { %3915 = vmatprep.subr.mxu0 %v3488_v53 }
 0x9a2   :  { %3916 = vmatpush3.msra.mxu0 %v3488_v53 }
 0x9a3   :  { %3920 = vmatprep.subr.mxu0 %v3495_v54 }
 0xa5b   :  { %v3873_v39 = vpop.f32.mrf.mxu0 }
 0xa5c   :  { %v1554_v4 = vadd.f32 %v3873_v39, %v3482_v2  ;;  %v1707_v39 = vrot.slane %v4621_v63, %v4278_v27 }
 0xa5d   :  { %v1548_v6 = vpop.f32.mrf.mxu0 }
 0xa5e   :  { %v1560_v7 = vmul.f32 0.044715, %v1554_v4  ;;  %v1549_v8 = vadd.f32 %v3482_v2, %v1548_v6  ;;  %v1558_v22 = vmul.f32 0.5, %v1554_v4 }
 0xa60   :  { %v1562_v9 = vmul.f32 %v1560_v7, %v1554_v4  ;;  %v1559_v10 = vmul.f32 0.044715, %v1549_v8  ;;  %v1557_v20 = vmul.f32 0.5, %v1549_v8 }
 0xa62   :  { %v1564_v1 = vmul.f32 %v1562_v9, %v1554_v4  ;;  %v1561_v50 = vmul.f32 %v1559_v10, %v1549_v8  ;;  %v1713_v9 = vrot.slane %v4621_v63, %v4286_v29 }
 0xa64   :  { %v1566_v11 = vadd.f32 %v1564_v1, %v1554_v4  ;;  %v1563_v12 = vmul.f32 %v1561_v50, %v1549_v8 }
 0xa66   :  { %v1565_v0 = vadd.f32 %v1563_v12, %v1549_v8  ;;  %v1568_v14 = vmul.f32 0.7978846, %v1566_v11  ;;  %v3494_v11 = vld [vmem:[%s4934_s2 + $0x110] sm:$0xff]  ;;  %v3493_v12 = vld [vmem:[%s4934_s2 + $0x108] sm:$0xff] }
 0xa68   :  { %v1567_v15 = vmul.f32 0.7978846, %v1565_v0  ;;  %4113 = vtanh.f32 %v1568_v14  ;;  %v3492_v0 = vld [vmem:[%s4934_s2 + $0x100] sm:$0xff]  ;;  %v3499_v14 = vld [vmem:[%s4934_s2 + $0x158] sm:$0xff] }
 0xa6a   :  { %4115 = vtanh.f32 %v1567_v15  ;;  %v3498_v15 = vld [vmem:[%s4934_s2 + $0x150] sm:$0xff] }
 0xa75   :  { %v4114_v16 = vpop.eup %4113 }
 0xa76   :  { %v1572_v19 = vadd.f32 1.0, %v4114_v16  ;;  %v3497_v16 = vld [vmem:[%s4934_s2 + $0x148] sm:$0xff] }
 0xa77   :  { %v4116_v18 = vpop.eup %4115 }
 0xa78   :  { %v1571_v21 = vadd.f32 1.0, %v4116_v18  ;;  %v1574_v25 = vmul.f32 %v1572_v19, %v1558_v22  ;;  %v3496_v18 = vld [vmem:[%s4934_s2 + $0x140] sm:$0xff] }
 0xa7a   :  { %v1573_v23 = vmul.f32 %v1571_v21, %v1557_v20  ;;  %v4670_v21 = vld [vmem:[%s4939_s7 + $0x8] sm:$0x3f] }
 0xa7c   :  { %3906 = vmatprep.mubr.f32.mxu1 %v1573_v23  ;;  %v1819_v23 = vrot.slane %v4670_v21, %v4336_v48 }
 0xa7d   :  { %3907 = vmatmul.mubr.f32.vlgmr.msra.gmra.mxu1 %v1574_v25 }
 0xa7e   :  { %3949 = vmatprep.mubr.msk.f32.mxu1 %vm4170_vm1, %v4169_v47 }
 0xb3d   :  { %v3908_v31 = vpop.f32.mrf.mxu1 }
 0xb3e   :  { %v1667_v32 = vadd.f32 %v3908_v31, %v1594_v30  ;;  %v1734_v31 = vrot.slane %v4670_v21, %v4278_v27 }
 0xb3f   :  { %v1661_v34 = vpop.f32.mrf.mxu1 }
 0xb40   :  { %v4590_v35 = vadd.f32 %v1667_v32, %v4502_v3  ;;  %v1662_v36 = vadd.f32 %v1661_v34, %v1594_v30  ;;  %v1898_v32 = vrot.slane %v4670_v21, %v270_v57 }
 0xb42   :  { %v4593_v38 = vadd.f32 %v1662_v36, %v4505_v5  ;;  %v1681_v40 = vsel %vm50_vm0, %v4590_v35, 0.0 }
 0xb43   :  { %1682 = vadd.xlane.f32.xlu1 %v1681_v40  ;;  %v3517_v40 = vld [vmem:[%s4934_s2 + $0xf8] sm:$0xff] }
 0xb44   :  { %v1678_v41 = vsel %vm50_vm0, %v4593_v38, 0.0 }
 0xb45   :  { %1679 = vadd.xlane.f32.xlu0 %v1678_v41 }
 0xbcc   :  { %v1683_v42 = vpop.xlane.xlu1 %1682 }
 0xbcd   :  { %v1685_v58 = vmul.f32 0.03125, %v1683_v42 }
 0xbce   :  { %v1680_v43 = vpop.xlane.xlu0 %1679 }
 0xbcf   :  { %v1687_v44 = vsub.f32 %v4590_v35, %v1685_v58  ;;  %v1684_v45 = vmul.f32 0.03125, %v1680_v43 }
 0xbd1   :  { %v1686_v3 = vsub.f32 %v4593_v38, %v1684_v45  ;;  %v1689_v46 = vmul.f32 %v1687_v44, %v1687_v44  ;;  %v3515_v45 = vld [vmem:[%s4934_s2 + $0xe8] sm:$0xff] }
 0xbd3   :  { %v1693_v5 = vsel %vm50_vm0, %v1689_v46, 0.0  ;;  %v1688_v28 = vmul.f32 %v1686_v3, %v1686_v3  ;;  %v3525_v46 = vld [vmem:[%s4934_s2 + $0x178] sm:$0xff] }
 0xbd4   :  { %1694 = vadd.xlane.f32.xlu1 %v1693_v5  ;;  %v3524_v5 = vld [vmem:[%s4934_s2 + $0x170] sm:$0xff] }
 0xbd5   :  { %v1690_v49 = vsel %vm50_vm0, %v1688_v28, 0.0  ;;  %v3523_v28 = vld [vmem:[%s4934_s2 + $0x168] sm:$0xff] }
 0xbd6   :  { %1691 = vadd.xlane.f32.xlu0 %v1690_v49  ;;  %v3522_v49 = vld [vmem:[%s4934_s2 + $0x160] sm:$0xff] }
 0xc5d   :  { %v1695_v55 = vpop.xlane.xlu1 %1694 }
 0xc5e   :  { %v1697_v56 = vmul.f32 0.03125, %v1695_v55 }
 0xc5f   :  { %v1692_v59 = vpop.xlane.xlu0 %1691 }
 0xc60   :  { %v1699_v37 = vadd.f32 1e-05, %v1697_v56  ;;  %v1696_v60 = vmul.f32 0.03125, %v1692_v59 }
 0xc62   :  { %4117 = vrsqrt.f32 %v1699_v37  ;;  %v1698_v61 = vadd.f32 1e-05, %v1696_v60 }
 0xc64   :  { %4119 = vrsqrt.f32 %v1698_v61 }
 0xc6f   :  { %v4118_v2 = vpop.eup %4117 }
 0xc70   :  { %v1703_v4 = vmul.f32 %v4118_v2, %v1687_v44  ;;  %v3516_v44 = vld [vmem:[%s4934_s2 + $0xf0] sm:$0xff]  ;;  %v4731_v2 = vrot.slane %v4670_v21, %v853_v24 }
 0xc71   :  { %v4120_v6 = vpop.eup %4119 }
 0xc72   :  { %v1702_v7 = vmul.f32 %v4120_v6, %v1686_v3  ;;  %v1709_v8 = vmul.f32 %v1707_v39, %v1703_v4  ;;  %v3514_v3 = vld [vmem:[%s4934_s2 + $0xe0] sm:$0xff] }
 0xc74   :  { %v1708_v10 = vmul.f32 %v1707_v39, %v1702_v7  ;;  %v4629_v50 = vadd.f32 %v1713_v9, %v1709_v8 }
 0xc76   :  { %v4627_v1 = vadd.f32 %v1713_v9, %v1708_v10 }
 0xc78   :  { %3917 = vmatprep.mubr.msk.f32.mxu0 %vm50_vm0, %v4627_v1 }
 0xc79   :  { %3918 = vmatmul.mubr.msk.f32.vlgmr.msra.gmra.mxu0 %vm50_vm0, %v4629_v50 }
 0xc7a   :  { %3921 = vmatpush3.msra.mxu0 %v3495_v54  ;;  %3928 = vmatprep.mubr.msk.f32.mxu0 %vm50_vm0, %v4627_v1 }
 0xc7b   :  { %3922 = vmatprep.subr.mxu0 %v3494_v11 }
 0xc7c   :  { %3923 = vmatpush3.msra.mxu0 %v3494_v11 }
 0xc7d   :  { %3924 = vmatprep.subr.mxu0 %v3493_v12 }
 0xc7e   :  { %3925 = vmatpush3.msra.mxu0 %v3493_v12 }
 0xc7f   :  { %3926 = vmatprep.subr.mxu0 %v3492_v0 }
 0xc80   :  { %3927 = vmatpush3.msra.mxu0 %v3492_v0 }
 0xc81   :  { %3929 = vmatmul.mubr.msk.f32.vlgmr.msra.gmra.mxu0 %vm50_vm0, %v4629_v50  ;;  %3931 = vmatprep.subr.mxu0 %v3499_v14 }
 0xc82   :  { %3932 = vmatpush3.msra.mxu0 %v3499_v14  ;;  %3939 = vmatprep.mubr.msk.f32.mxu0 %vm50_vm0, %v4627_v1 }
 0xc83   :  { %3933 = vmatprep.subr.mxu0 %v3498_v15 }
 0xc84   :  { %3934 = vmatpush3.msra.mxu0 %v3498_v15 }
 0xc85   :  { %3935 = vmatprep.subr.mxu0 %v3497_v16 }
 0xc86   :  { %3936 = vmatpush3.msra.mxu0 %v3497_v16 }
 0xc87   :  { %3937 = vmatprep.subr.mxu0 %v3496_v18 }
 0xc88   :  { %3938 = vmatpush3.msra.mxu0 %v3496_v18 }
 0xc89   :  { %3940 = vmatmul.mubr.msk.f32.vlgmr.msra.gmra.mxu0 %vm50_vm0, %v4629_v50  ;;  %3942 = vmatprep.subr.mxu0 %v4169_v47 }
 0xc8a   :  { %3944 = vmatprep.mubr.msk.f32.mxu0 %vm4170_vm1, %v4169_v47 }
 0xd39   :  { %v3919_v19 = vpop.f32.mrf.mxu0 }
 0xd3a   :  { %v1813_v58 = vadd.f32 %v3919_v19, %v1734_v31 }
 0xd3b   :  { %v1807_v20 = vpop.f32.mrf.mxu0 }
 0xd3c   :  { %v1808_v34 = vadd.f32 %v1807_v20, %v1734_v31  ;;  %v3521_v20 = vld [vmem:[%s4934_s2 + $0x138] sm:$0xff]  ;;  %v3518_v31 = vld [vmem:[%s4934_s2 + $0x120] sm:$0xff] }
 0xd41   :  { %v3930_v22 = vpop.f32.mrf.mxu0 }
 0xd42   :  { %v1892_v36 = vadd.f32 %v3930_v22, %v1819_v23 }
 0xd43   :  { %v1886_v25 = vpop.f32.mrf.mxu0 }
 0xd44   :  { %v1887_v30 = vadd.f32 %v1886_v25, %v1819_v23  ;;  %v3520_v25 = vld [vmem:[%s4934_s2 + $0x130] sm:$0xff] }
 0xd46   :  { %3943 = vmatpush3.xpose.msk.msra.mxu0 %vm347_vm2, %v1887_v30  ;;  %v3519_v30 = vld [vmem:[%s4934_s2 + $0x128] sm:$0xff] }
 0xd47   :  { %3952 = vmatprep.subr.mxu0 %v4169_v47 }
 0xd49   :  { %v3941_v41 = vpop.f32.mrf.mxu0  ;;  %3945 = vmatmul.mubr.msk.f32.vlgmr.msra.gmra.mxu0 %vm347_vm2, %v1808_v34 }
 0xd4a   :  { %v4685_v42 = vadd.f32 %v3941_v41, %v1898_v32  ;;  %3953 = vmatpush3.xpose.msk.msra.mxu0 %vm347_vm2, %v1892_v36  ;;  %3954 = vmatprep.mubr.msk.f32.mxu0 %vm4170_vm1, %v4169_v47  ;;  %v2319_v41 = vrot.slane %v4670_v21, %v4286_v29 }
 0xd4b   :  { %v1965_v57 = vpop.f32.mrf.mxu0  ;;  %3962 = vmatprep.subr.mxu0 %v3517_v40 }
 0xd4c   :  { %v1966_v43 = vadd.f32 %v1965_v57, %v1898_v32 }
 0xd4d   :  { %3955 = vmatmul.mubr.msk.f32.vlgmr.msra.gmra.mxu0 %vm347_vm2, %v1813_v58 }
 0xd4e   :  { %3948 = vmatpush3.msra.mxu1 %v1966_v43  ;;  %3963 = vmatpush3.msra.mxu0 %v3517_v40  ;;  %v2398_v40 = vrot.slane %v4670_v21, %v4450_v62 }
 0xd4f   :  { %3970 = vmatprep.mubr.msk.f32.mxu0 %vm50_vm0, %v4627_v1  ;;  %3964 = vmatprep.subr.mxu0 %v3516_v44 }
 0xd50   :  { %3965 = vmatpush3.msra.mxu0 %v3516_v44  ;;  %3957 = vmatprep.subr.mxu1 %v4169_v47 }
 0xd51   :  { %3966 = vmatprep.subr.mxu0 %v3515_v45 }
 0xd52   :  { %3967 = vmatpush3.msra.mxu0 %v3515_v45 }
 0xd53   :  { %3968 = vmatprep.subr.mxu0 %v3514_v3 }
 0xd54   :  { %3969 = vmatpush3.msra.mxu0 %v3514_v3 }
 0xd55   :  { %3971 = vmatmul.mubr.msk.f32.vlgmr.msra.gmra.mxu0 %vm50_vm0, %v4629_v50  ;;  %3984 = vmatprep.subr.mxu0 %v3525_v46 }
 0xd56   :  { %3985 = vmatpush3.msra.mxu0 %v3525_v46  ;;  %3992 = vmatprep.mubr.msk.f32.mxu0 %vm50_vm0, %v4627_v1 }
 0xd57   :  { %3986 = vmatprep.subr.mxu0 %v3524_v5 }
 0xd58   :  { %3987 = vmatpush3.msra.mxu0 %v3524_v5 }
 0xd59   :  { %3988 = vmatprep.subr.mxu0 %v3523_v28 }
 0xd5a   :  { %3989 = vmatpush3.msra.mxu0 %v3523_v28 }
 0xd5b   :  { %3990 = vmatprep.subr.mxu0 %v3522_v49 }
 0xd5c   :  { %3991 = vmatpush3.msra.mxu0 %v3522_v49 }
 0xd5d   :  { %3993 = vmatmul.mubr.msk.f32.vlgmr.msra.gmra.mxu0 %vm50_vm0, %v4629_v50  ;;  %4005 = vmatprep.subr.mxu0 %v4169_v47 }
 0xd5e   :  { %4007 = vmatprep.mubr.msk.f32.mxu0 %vm4170_vm1, %v4169_v47 }
 0xe09   :  { %v2046_v33 = vpop.f32.mrf.mxu0 }
 0xe0a   :  { %v2050_v51 = vmul.f32 0.25, %v2046_v33 }
 0xe0b   :  { %v3946_v52 = vpop.f32.mrf.mxu0 }
 0xe0c   :  { %v2051_v53 = vadd.f32 %v2050_v51, %v4404_v17 }
 0xe0d   :  { %v2208_v54 = vpop.f32.mrf.mxu0 }
 0xe0e   :  { %v2212_v55 = vmul.f32 0.25, %v2208_v54  ;;  %v2052_v56 = vsel %vm427_vm3, %v2051_v53, -inf }
 0xe0f   :  { %2053 = vmax.xlane.f32.xlu0 %v2052_v56  ;;  %v3956_v59 = vpop.f32.mrf.mxu0 }
 0xe10   :  { %v2213_v37 = vadd.f32 %v4399_v13, %v2212_v55 }
 0xe12   :  { %v2214_v60 = vsel %vm427_vm3, %v2213_v37, -inf }
 0xe13   :  { %2215 = vmax.xlane.f32.xlu1 %v2214_v60 }
 0xe15   :  { %v3972_v61 = vpop.f32.mrf.mxu0 }
 0xe16   :  { %v2392_v43 = vadd.f32 %v3972_v61, %v2319_v41 }
 0xe17   :  { %v2386_v39 = vpop.f32.mrf.mxu0 }
 0xe18   :  { %v2387_v45 = vadd.f32 %v2386_v39, %v2319_v41 }
 0xe1d   :  { %v3994_v4 = vpop.f32.mrf.mxu0 }
 0xe1e   :  { %v4734_v6 = vadd.f32 %v3994_v4, %v4731_v2 }
 0xe1f   :  { %v2544_v44 = vpop.f32.mrf.mxu0 }
 0xe20   :  { %v2545_v3 = vadd.f32 %v2544_v44, %v4731_v2 }
 0xe98   :  { %v2054_v7 = vpop.xlane.xlu0 %2053 }
 0xe99   :  { %v2055_v8 = vsub.f32 %v2051_v53, %v2054_v7 }
 0xe9b   :  { %v2056_v9 = vmul.f32 1.442695, %v2055_v8 }
 0xe9c   :  { %v2216_v10 = vpop.xlane.xlu1 %2215 }
 0xe9d   :  { %4121 = vpow2.f32 %v2056_v9  ;;  %v2217_v11 = vsub.f32 %v2213_v37, %v2216_v10 }
 0xe9f   :  { %v2218_v12 = vmul.f32 1.442695, %v2217_v11  ;;  %v3513_v11 = vld [vmem:[%s4935_s3 + $0x28] sm:$0xff] }
 0xea1   :  { %4123 = vpow2.f32 %v2218_v12 }
 0xeaa   :  { %v4122_v0 = vpop.eup %4121 }
 0xeab   :  { %v2058_v14 = vsel %vm427_vm3, %v4122_v0, 0.0 }
 0xeac   :  { %2059 = vadd.xlane.f32.xlu0 %v2058_v14  ;;  %v3538_v14 = vld [vmem:[%s4935_s3 + $0x30] sm:$0xff] }
 0xeae   :  { %v4124_v26 = vpop.eup %4123 }
 0xeaf   :  { %v2220_v24 = vsel %vm427_vm3, %v4124_v26, 0.0 }
 0xeb0   :  { %2221 = vadd.xlane.f32.xlu1 %v2220_v24 }
 0xf35   :  { %v2060_v15 = vpop.xlane.xlu0 %2059 }
 0xf36   :  { %4125 = vrcp.f32 %v2060_v15 }
 0xf39   :  { %v2222_v16 = vpop.xlane.xlu1 %2221 }
 0xf3a   :  { %4127 = vrcp.f32 %v2222_v16 }
 0xf43   :  { %v4126_v18 = vpop.eup %4125 }
 0xf44   :  { %v2062_v19 = vmul.f32 %v4126_v18, %v4122_v0  ;;  %v3512_v0 = vld [vmem:[%s4935_s3 + $0x20] sm:$0xff] }
 0xf46   :  { %3950 = vmatmul.mubr.msk.f32.vlgmr.msra.gmra.mxu1 %vm427_vm3, %v2062_v19  ;;  %v4811_v19 = vld [vmem:[%s4940_s8 + $0x2] sm:$0x3]  ;;  %s4171_s8 = smov [#allocation2]  }
 0xf47   :  { %v4128_v22 = vpop.eup %4127  ;;  %3958 = vmatpush3.msra.mxu1 %v4685_v42  ;;  %3959 = vmatprep.mubr.msk.f32.mxu1 %vm4170_vm1, %v4169_v47  ;;  %s3423_s24 = sshll.u32 %s4171_s8, 4  ;;  %s3424_s24 = int_to_ptr.vmem [resolvable:$true] %s3423_s24 }
 0xf48   :  { %3973 = vmatprep.subr.mxu1 %v3521_v20  ;;  %v2224_v23 = vmul.f32 %v4128_v22, %v4124_v26  ;;  %p4152_p1 = scmp.lt.s32.totalorder %s3424_s24, %s3424_s24 }
 0xf4a   :  { %3960 = vmatmul.mubr.msk.f32.vlgmr.msra.gmra.mxu1 %vm427_vm3, %v2224_v23  ;;  %v3047_v23 = vrot.slane %v4811_v19, %v4278_v27 }
 0xf4b   :  { %3974 = vmatpush3.msra.mxu1 %v3521_v20  ;;  %3981 = vmatprep.mubr.msk.f32.mxu1 %vm50_vm0, %v4627_v1 }
 0xf4c   :  { %3975 = vmatprep.subr.mxu1 %v3520_v25 }
 0xf4d   :  { %3976 = vmatpush3.msra.mxu1 %v3520_v25 }
 0xf4e   :  { %3977 = vmatprep.subr.mxu1 %v3519_v30 }
 0xf4f   :  { %3978 = vmatpush3.msra.mxu1 %v3519_v30 }
 0xf50   :  { %3979 = vmatprep.subr.mxu1 %v3518_v31 }
 0xf51   :  { %3980 = vmatpush3.msra.mxu1 %v3518_v31 }
 0xf52   :  { %3982 = vmatmul.mubr.msk.f32.vlgmr.msra.gmra.mxu1 %vm50_vm0, %v4629_v50  ;;  %3995 = vmatprep.subr.mxu1 %v4169_v47 }
 0xf53   :  { %3997 = vmatprep.mubr.msk.f32.mxu1 %vm4170_vm1, %v4169_v47 }
0x1006   :  { %v4762_v1 = vpop.f32.mrf.mxu1 }
0x1008   :  { %v3951_v32 = vpop.f32.mrf.mxu1 }
0x100a   :  { %v4764_v34 = vpop.f32.mrf.mxu1 }
0x100c   :  { %v3961_v36 = vpop.f32.mrf.mxu1 }
0x1012   :  { %v3983_v42 = vpop.f32.mrf.mxu1 }
0x1013   :  { %v2471_v58 = vadd.f32 %v3983_v42, %v2398_v40 }
0x1014   :  { %v2465_v50 = vpop.f32.mrf.mxu1 }
0x1015   :  { %v2466_v57 = vadd.f32 %v2465_v50, %v2398_v40  ;;  %4006 = vmatpush3.xpose.msk.msra.mxu0 %vm347_vm2, %v2471_v58 }
0x1017   :  { %3996 = vmatpush3.xpose.msk.msra.mxu1 %vm347_vm2, %v2466_v57 }
0x1018   :  { %4008 = vmatmul.mubr.msk.f32.vlgmr.msra.gmra.mxu0 %vm347_vm2, %v2392_v43  ;;  %4000 = vmatprep.subr.mxu1 %v4169_v47 }
0x101a   :  { %3998 = vmatmul.mubr.msk.f32.vlgmr.msra.gmra.mxu1 %vm347_vm2, %v2387_v45 }
0x101b   :  { %4001 = vmatpush3.msra.mxu1 %v2545_v3  ;;  %4002 = vmatprep.mubr.msk.f32.mxu1 %vm4170_vm1, %v4169_v47 }
0x101c   :  { %4010 = vmatprep.subr.mxu1 %v4169_v47 }
0x10d8   :  { %v2787_v21 = vpop.f32.mrf.mxu0 }
0x10d9   :  { %v2791_v46 = vmul.f32 0.25, %v2787_v21  ;;  %v3547_v21 = vld [vmem:[%s4936_s4 + $0x38] sm:$0xff] }
0x10da   :  { %v2625_v5 = vpop.f32.mrf.mxu1  ;;  %v4009_v28 = vpop.f32.mrf.mxu0 }
0x10db   :  { %v2629_v49 = vmul.f32 0.25, %v2625_v5  ;;  %v2792_v33 = vadd.f32 %v4399_v13, %v2791_v46  ;;  %v3546_v46 = vld [vmem:[%s4936_s4 + $0x30] sm:$0xff]  ;;  %v3545_v5 = vld [vmem:[%s4936_s4 + $0x28] sm:$0xff]  ;;  %v3544_v28 = vld [vmem:[%s4936_s4 + $0x20] sm:$0xff] }
0x10dc   :  { %v3999_v51 = vpop.f32.mrf.mxu1 }
0x10dd   :  { %v2793_v52 = vsel %vm427_vm3, %v2792_v33, -inf  ;;  %v2630_v53 = vadd.f32 %v2629_v49, %v4404_v17 }
0x10de   :  { %2794 = vmax.xlane.f32.xlu1 %v2793_v52 }
0x10df   :  { %v2631_v54 = vsel %vm427_vm3, %v2630_v53, -inf }
0x10e0   :  { %2632 = vmax.xlane.f32.xlu0 %v2631_v54 }
0x1167   :  { %v2795_v55 = vpop.xlane.xlu1 %2794 }
0x1168   :  { %v2796_v56 = vsub.f32 %v2792_v33, %v2795_v55 }
0x1169   :  { %v2633_v59 = vpop.xlane.xlu0 %2632 }
0x116a   :  { %v2797_v37 = vmul.f32 1.442695, %v2796_v56  ;;  %v2634_v60 = vsub.f32 %v2630_v53, %v2633_v59  ;;  %v3079_v56 = vrot.slane %v4621_v63, %v4336_v48  ;;  %v3567_v48 = vld [vmem:[%s4937_s5 + $0xf8] sm:$0xff] }
0x116c   :  { %4129 = vpow2.f32 %v2797_v37  ;;  %v2635_v61 = vmul.f32 1.442695, %v2634_v60 }
0x116e   :  { %4131 = vpow2.f32 %v2635_v61 }
0x1179   :  { %v4130_v2 = vpop.eup %4129 }
0x117a   :  { %v2799_v13 = vsel %vm427_vm3, %v4130_v2, 0.0 }
0x117b   :  { %v4132_v39 = vpop.eup %4131  ;;  %2800 = vadd.xlane.f32.xlu1 %v2799_v13 }
0x117c   :  { %v2637_v4 = vsel %vm427_vm3, %v4132_v39, 0.0 }
0x117d   :  { %2638 = vadd.xlane.f32.xlu0 %v2637_v4 }
0x1204   :  { %v2801_v17 = vpop.xlane.xlu1 %2800 }
0x1206   :  { %v2639_v7 = vpop.xlane.xlu0 %2638 }
0x1207   :  { %4133 = vrcp.f32 %v2639_v7  ;;  %v3563_v7 = vld [vmem:[%s4937_s5 + $0xd8] sm:$0xff] }
0x1208   :  { %4135 = vrcp.f32 %v2801_v17  ;;  %v3564_v17 = vld [vmem:[%s4937_s5 + $0xe0] sm:$0xff] }
0x1214   :  { %v4134_v8 = vpop.eup %4133 }
0x1215   :  { %v2641_v9 = vmul.f32 %v4134_v8, %v4132_v39  ;;  %v4136_v10 = vpop.eup %4135  ;;  %v3562_v8 = vld [vmem:[%s4937_s5 + $0xd0] sm:$0xff] }
0x1216   :  { %v2803_v12 = vmul.f32 %v4136_v10, %v4130_v2  ;;  %v3085_v2 = vrot.slane %v4621_v63, %v4450_v62  ;;  %v3566_v62 = vld [vmem:[%s4937_s5 + $0xf0] sm:$0xff]  ;;  %v3565_v63 = vld [vmem:[%s4937_s5 + $0xe8] sm:$0xff]  ;;  %v3560_v10 = vld [vmem:[%s4937_s5 + $0xc0] sm:$0xff] }
0x1217   :  { %4003 = vmatmul.mubr.msk.f32.vlgmr.msra.gmra.mxu1 %vm427_vm3, %v2641_v9  ;;  %v3561_v9 = vld [vmem:[%s4937_s5 + $0xc8] sm:$0xff] }
0x1218   :  { %4011 = vmatpush3.msra.mxu1 %v4734_v6  ;;  %4012 = vmatprep.mubr.msk.f32.mxu1 %vm4170_vm1, %v4169_v47  ;;  %v3539_v6 = vld [vmem:[%s4935_s3 + $0x38] sm:$0xff] }
0x1219   :  { %4022 = vmatprep.subr.mxu1 %v3513_v11  ;;  %4015 = vmatprep.subr.mxu0 %v3539_v6 }
0x121a   :  { %4016 = vmatpush3.msra.mxu0 %v3539_v6  ;;  %v3556_v6 = vld [vmem:[%s4937_s5 + $0xa0] sm:$0xff] }
0x121b   :  { %4013 = vmatmul.mubr.msk.f32.vlgmr.msra.gmra.mxu1 %vm427_vm3, %v2803_v12  ;;  %4017 = vmatprep.subr.mxu0 %v3538_v14  ;;  %v3558_v12 = vld [vmem:[%s4937_s5 + $0xb0] sm:$0xff] }
0x121c   :  { %4023 = vmatpush3.msra.mxu1 %v3513_v11  ;;  %4026 = vmatprep.mubr.msk.f32.mxu1 %vm347_vm2, %v4762_v1  ;;  %v3559_v11 = vld [vmem:[%s4937_s5 + $0xb8] sm:$0xff] }
0x121d   :  { %4024 = vmatprep.subr.mxu1 %v3512_v0  ;;  %4018 = vmatpush3.msra.mxu0 %v3538_v14  ;;  %v3555_v14 = vld [vmem:[%s4937_s5 + $0x98] sm:$0xff] }
0x121e   :  { %4025 = vmatpush3.msra.mxu1 %v3512_v0  ;;  %4029 = vmatprep.subr.mxu0 %v3547_v21  ;;  %v3557_v0 = vld [vmem:[%s4937_s5 + $0xa8] sm:$0xff] }
0x121f   :  { %4027 = vmatmul.mubr.msk.f32.vlgmr.msra.gmra.mxu1 %vm347_vm2, %v4764_v34  ;;  %4040 = vmatprep.subr.mxu1 %v3567_v48 }
0x1220   :  { %4041 = vmatpush3.msra.mxu1 %v3567_v48 }
0x1221   :  { %4042 = vmatprep.subr.mxu1 %v3566_v62 }
0x1222   :  { %4043 = vmatpush3.msra.mxu1 %v3566_v62  ;;  %v3298_v62 = vld [vmem:[%s4942_s10] sm:$0x3]  ;;  %s4147_s10 = scalar_lea.vmem %s3424_s24, 32 }
0x1223   :  { %4044 = vmatprep.subr.mxu1 %v3565_v63  ;;  %p4148_p0 = scmp.ne.s32.totalorder %s3424_s24, %s4147_s10  ;;  %p4153_p2 = scmp.lt.s32.totalorder %s4147_s10, %s4147_s10 }
0x1224   :  { %4045 = vmatpush3.msra.mxu1 %v3565_v63  ;;  %v3324_v63 = vrot.slane %v3298_v62, %v4278_v27 }
0x1225   :  { %4046 = vmatprep.subr.mxu1 %v3564_v17  ;;  %p4154_p3 = por %p4153_p2, %p4152_p1 }
0x1226   :  { %4047 = vmatpush3.msra.mxu1 %v3564_v17 }
0x1227   :  { %4048 = vmatprep.subr.mxu1 %v3563_v7  ;;  %p4155_p4 = pnand %p4154_p3, %p4148_p0 }
0x1228   :  { %4049 = vmatpush3.msra.mxu1 %v3563_v7 }
0x1229   :  { %4050 = vmatprep.subr.mxu1 %v3562_v8 }
0x122a   :  { %4051 = vmatpush3.msra.mxu1 %v3562_v8  ;;  %v3329_v8 = vrot.slane %v3298_v62, %v4286_v29 }
0x122b   :  { %4052 = vmatprep.subr.mxu1 %v3561_v9 }
0x122c   :  { %4053 = vmatpush3.msra.mxu1 %v3561_v9 }
0x122d   :  { %4054 = vmatprep.subr.mxu1 %v3560_v10 }
0x122e   :  { %4055 = vmatpush3.msra.mxu1 %v3560_v10 }
0x122f   :  { %4056 = vmatprep.subr.mxu1 %v3559_v11 }
0x1230   :  { %4057 = vmatpush3.msra.mxu1 %v3559_v11 }
0x1231   :  { %4058 = vmatprep.subr.mxu1 %v3558_v12 }
0x1232   :  { %4059 = vmatpush3.msra.mxu1 %v3558_v12 }
0x1233   :  { %4060 = vmatprep.subr.mxu1 %v3557_v0 }
0x1234   :  { %4061 = vmatpush3.msra.mxu1 %v3557_v0 }
0x1235   :  { %4062 = vmatprep.subr.mxu1 %v3556_v6 }
0x1236   :  { %4063 = vmatpush3.msra.mxu1 %v3556_v6 }
0x1237   :  { %4064 = vmatprep.subr.mxu1 %v3555_v14 }
0x1238   :  { %4065 = vmatpush3.msra.mxu1 %v3555_v14 }
0x12d7   :  { %v2711_v26 = vpop.f32.mrf.mxu1 }
0x12d8   :  { %4019 = vmatprep.mubr.msk.f32.mxu0 %vm347_vm2, %v2711_v26  ;;  %v3554_v26 = vld [vmem:[%s4937_s5 + $0x90] sm:$0xff] }
0x12d9   :  { %v4004_v24 = vpop.f32.mrf.mxu1  ;;  %4066 = vmatprep.subr.mxu1 %v3554_v26 }
0x12da   :  { %v3553_v24 = vld [vmem:[%s4937_s5 + $0x88] sm:$0xff]  ;;  %4067 = vmatpush3.msra.mxu1 %v3554_v26 }
0x12db   :  { %v2873_v15 = vpop.f32.mrf.mxu1  ;;  %4068 = vmatprep.subr.mxu1 %v3553_v24 }
0x12dc   :  { %4020 = vmatmul.mubr.msk.f32.vlgmr.msra.gmra.mxu0 %vm347_vm2, %v2873_v15  ;;  %v3552_v15 = vld [vmem:[%s4937_s5 + $0x80] sm:$0xff]  ;;  %4069 = vmatpush3.msra.mxu1 %v3553_v24 }
0x12dd   :  { %v4014_v16 = vpop.f32.mrf.mxu1  ;;  %4030 = vmatpush3.msra.mxu0 %v3547_v21  ;;  %4070 = vmatprep.subr.mxu1 %v3552_v15 }
0x12de   :  { %4031 = vmatprep.subr.mxu0 %v3546_v46  ;;  %4071 = vmatpush3.msra.mxu1 %v3552_v15  ;;  %v3549_v16 = vld [vmem:[%s4941_s9 + $0x1] ss:$0 sm:$0xff] }
0x12df   :  { %v4028_v18 = vpop.f32.mrf.mxu1  ;;  %4032 = vmatpush3.msra.mxu0 %v3546_v46  ;;  %v3220_v46 = vrot.slane %v4811_v19, %v4286_v29 }
0x12e0   :  { %4033 = vmatprep.subr.mxu0 %v3545_v5 }
0x12e1   :  { %v3033_v25 = vpop.f32.mrf.mxu1  ;;  %4034 = vmatpush3.msra.mxu0 %v3545_v5 }
0x12e2   :  { %4035 = vmatprep.subr.mxu0 %v3544_v28 }
0x12e3   :  { %4036 = vmatpush3.msra.mxu0 %v3544_v28 }
0x12e4   :  { %4075 = vmatprep.subr.mxu0 %v4169_v47 }
0x139c   :  { %v4021_v20 = vpop.f32.mrf.mxu0 }
0x139d   :  { %v3039_v22 = vadd.f32 %v4028_v18, %v4021_v20 }
0x139e   :  { %v2952_v30 = vpop.f32.mrf.mxu0 }
0x139f   :  { %v3043_v31 = vadd.f32 %v3039_v22, %v4590_v35  ;;  %v3034_v1 = vadd.f32 %v3033_v25, %v2952_v30 }
0x13a1   :  { %v4816_v32 = vadd.f32 %v3047_v23, %v3043_v31  ;;  %v3042_v34 = vadd.f32 %v3034_v1, %v4593_v38 }
0x13a3   :  { %v4819_v36 = vadd.f32 %v3047_v23, %v3042_v34  ;;  %v3053_v40 = vsel %vm50_vm0, %v4816_v32, 0.0 }
0x13a4   :  { %3054 = vadd.xlane.f32.xlu1 %v3053_v40 }
0x13a5   :  { %v3050_v41 = vsel %vm50_vm0, %v4819_v36, 0.0 }
0x13a6   :  { %3051 = vadd.xlane.f32.xlu0 %v3050_v41 }
0x142d   :  { %v3055_v42 = vpop.xlane.xlu1 %3054 }
0x142e   :  { %v3057_v58 = vmul.f32 0.03125, %v3055_v42 }
0x142f   :  { %v3052_v50 = vpop.xlane.xlu0 %3051 }
0x1430   :  { %v3059_v35 = vsub.f32 %v4816_v32, %v3057_v58  ;;  %v3056_v57 = vmul.f32 0.03125, %v3052_v50 }
0x1432   :  { %v3058_v43 = vsub.f32 %v4819_v36, %v3056_v57  ;;  %v3061_v44 = vmul.f32 %v3059_v35, %v3059_v35 }
0x1434   :  { %v3065_v38 = vsel %vm50_vm0, %v3061_v44, 0.0  ;;  %v3060_v45 = vmul.f32 %v3058_v43, %v3058_v43 }
0x1435   :  { %3066 = vadd.xlane.f32.xlu1 %v3065_v38 }
0x1436   :  { %v3062_v3 = vsel %vm50_vm0, %v3060_v45, 0.0 }
0x1437   :  { %3063 = vadd.xlane.f32.xlu0 %v3062_v3 }
0x14be   :  { %v3067_v49 = vpop.xlane.xlu1 %3066 }
0x14bf   :  { %v3069_v33 = vmul.f32 0.03125, %v3067_v49 }
0x14c0   :  { %v3064_v51 = vpop.xlane.xlu0 %3063 }
0x14c1   :  { %v3071_v52 = vadd.f32 1e-05, %v3069_v33  ;;  %v3068_v53 = vmul.f32 0.03125, %v3064_v51 }
0x14c3   :  { %4137 = vrsqrt.f32 %v3071_v52  ;;  %v3070_v54 = vadd.f32 1e-05, %v3068_v53 }
0x14c5   :  { %4139 = vrsqrt.f32 %v3070_v54 }
0x14d0   :  { %v4138_v55 = vpop.eup %4137 }
0x14d1   :  { %v3075_v59 = vmul.f32 %v4138_v55, %v3059_v35 }
0x14d2   :  { %v4140_v37 = vpop.eup %4139 }
0x14d3   :  { %v3074_v60 = vmul.f32 %v4140_v37, %v3058_v43  ;;  %v3081_v61 = vmul.f32 %v3079_v56, %v3075_v59 }
0x14d5   :  { %v3080_v13 = vmul.f32 %v3079_v56, %v3074_v60  ;;  %v3087_v4 = vadd.f32 %v3085_v2, %v3081_v61 }
0x14d7   :  { %v3086_v39 = vadd.f32 %v3085_v2, %v3080_v13  ;;  %v3332_v2 = vld [vmem:[%s4943_s11 + $0x8] sm:$0xff]  ;;  %v3331_v13 = vld [vmem:[%s4943_s11] sm:$0xff] }
0x14d9   :  { %4037 = vmatprep.mubr.msk.f32.mxu0 %vm50_vm0, %v3086_v39 }
0x14da   :  { %4038 = vmatmul.mubr.msk.f32.vlgmr.msra.gmra.mxu0 %vm50_vm0, %v3087_v4 }
0x14db   :  { %4083 = vmatprep.mubr.msk.f32.mxu0 %vm4170_vm1, %v4169_v47 }
0x159a   :  { %v4039_v18 = vpop.f32.mrf.mxu0 }
0x159b   :  { %v3179_v20 = vadd.f32 %v4039_v18, %v3549_v16 }
0x159c   :  { %v3173_v22 = vpop.f32.mrf.mxu0 }
0x159d   :  { %v3185_v23 = vmul.f32 0.044715, %v3179_v20  ;;  %v3174_v25 = vadd.f32 %v3549_v16, %v3173_v22  ;;  %v3183_v45 = vmul.f32 0.5, %v3179_v20 }
0x159f   :  { %v3187_v30 = vmul.f32 %v3185_v23, %v3179_v20  ;;  %v3184_v31 = vmul.f32 0.044715, %v3174_v25  ;;  %v3182_v44 = vmul.f32 0.5, %v3174_v25 }
0x15a1   :  { %v3189_v1 = vmul.f32 %v3187_v30, %v3179_v20  ;;  %v3186_v34 = vmul.f32 %v3184_v31, %v3174_v25 }
0x15a3   :  { %v3191_v40 = vadd.f32 %v3189_v1, %v3179_v20  ;;  %v3188_v41 = vmul.f32 %v3186_v34, %v3174_v25 }
0x15a5   :  { %v3190_v42 = vadd.f32 %v3188_v41, %v3174_v25  ;;  %v3193_v58 = vmul.f32 0.7978846, %v3191_v40 }
0x15a7   :  { %v3192_v50 = vmul.f32 0.7978846, %v3190_v42  ;;  %4141 = vtanh.f32 %v3193_v58 }
0x15a9   :  { %4143 = vtanh.f32 %v3192_v50 }
0x15b4   :  { %v4142_v35 = vpop.eup %4141 }
0x15b5   :  { %v3197_v43 = vadd.f32 1.0, %v4142_v35 }
0x15b6   :  { %v4144_v57 = vpop.eup %4143 }
0x15b7   :  { %v3196_v38 = vadd.f32 1.0, %v4144_v57  ;;  %v3199_v21 = vmul.f32 %v3197_v43, %v3183_v45 }
0x15b9   :  { %v3198_v3 = vmul.f32 %v3196_v38, %v3182_v44 }
0x15bb   :  { %4072 = vmatprep.mubr.f32.mxu1 %v3198_v3 }
0x15bc   :  { %4073 = vmatmul.mubr.f32.vlgmr.msra.gmra.mxu1 %v3199_v21 }
0x167c   :  { %v4074_v5 = vpop.f32.mrf.mxu1 }
0x167d   :  { %v3293_v28 = vadd.f32 %v4074_v5, %v3220_v46 }
0x167e   :  { %v3287_v49 = vpop.f32.mrf.mxu1 }
0x167f   :  { %v3297_v33 = vadd.f32 %v3293_v28, %v4816_v32  ;;  %v3288_v51 = vadd.f32 %v3287_v49, %v3220_v46  ;;  %v3334_v32 = vld [vmem:[%s4943_s11 + $0x18] sm:$0xff] }
0x1680   :  { %4076 = vmatpush3.msra.mxu0 %v3334_v32 }
0x1681   :  { %v3296_v52 = vadd.f32 %v3288_v51, %v4819_v36  ;;  %v3303_v53 = vrot.slane %v3297_v33, 6  ;;  %v3333_v36 = vld [vmem:[%s4943_s11 + $0x10] sm:$0xff]  ;;  %4077 = vmatprep.subr.mxu0 %v4169_v47 }
0x1682   :  { %4078 = vmatpush3.msra.mxu0 %v3333_v36 }
0x1683   :  { %v3300_v54 = vrot.slane %v3296_v52, 7  ;;  %4079 = vmatprep.subr.mxu0 %v4169_v47 }
0x1684   :  { %4080 = vmatpush3.msra.mxu0 %v3332_v2 }
0x1685   :  { %v3306_v55 = vsel %vm3305_vm4, %v3300_v54, %v3303_v53  ;;  %4081 = vmatprep.subr.mxu0 %v4169_v47  ;;  %v3568_v47 = vld [vmem:[%s4944_s12] ss:$0 sm:$0xff] }
0x1686   :  { %v3308_v56 = vsel %vm3307_vm5, %v3306_v55, 0.0  ;;  %4082 = vmatpush3.msra.mxu0 %v3331_v13 }
0x1687   :  { %3309 = vadd.xlane.f32.xlu0 %v3308_v56 }
0x1710   :  { %v3310_v59 = vpop.xlane.xlu0 %3309 }
0x1711   :  { %v3311_v37 = vmul.f32 0.03125, %v3310_v59 }
0x1713   :  { %v3312_v60 = vsub.f32 %v3306_v55, %v3311_v37 }
0x1715   :  { %v3313_v61 = vmul.f32 %v3312_v60, %v3312_v60 }
0x1717   :  { %v3314_v19 = vsel %vm3307_vm5, %v3313_v61, 0.0 }
0x1718   :  { %3315 = vadd.xlane.f32.xlu1 %v3314_v19 }
0x17a1   :  { %v3316_v39 = vpop.xlane.xlu1 %3315 }
0x17a2   :  { %v3317_v4 = vmul.f32 0.03125, %v3316_v39 }
0x17a4   :  { %v3318_v48 = vadd.f32 1e-05, %v3317_v4 }
0x17a6   :  { %4145 = vrsqrt.f32 %v3318_v48 }
0x17b3   :  { %v4146_v17 = vpop.eup %4145 }
0x17b4   :  { %v3320_v7 = vmul.f32 %v4146_v17, %v3312_v60 }
0x17b6   :  { %v3325_v9 = vmul.f32 %v3324_v63, %v3320_v7 }
0x17b8   :  { %v3330_v10 = vadd.f32 %v3329_v8, %v3325_v9 }
0x17ba   :  { %4084 = vmatmul.mubr.msk.f32.vlgmr.msra.gmra.mxu0 %vm50_vm0, %v3330_v10 }
0x187a   :  { %v3411_v11 = vpop.f32.mrf.mxu0 }
0x187b   :  { %v3412_v12 = vadd.f32 %v3568_v47, %v3411_v11 }
0x187c   :  { %v4085_v0 = vpop.f32.mrf.mxu0 }
0x187d   :  { %3416 = vst.msk [vmem:[#allocation2] sm:$0x3] %vm3415_vm6, %v3412_v12 }
0x187e   :  { %4158 = shalt.err (!%p4155_p4)
}
0x187f   :  { %3426 = dma.vmem_to_hbm [thread:$0]  %s3424_s24, 32, %s4945_s13, [#allocation3]  }
0x1880   :  { %4167 = dma.done.wait [#allocation3], 32  }
0x1881   :  { %4168 = vsyncadd [#allocation3], 4294967264 }
0x1882   :  { %3430 = vsyncpa [#allocation3], 1 }

</bundles_post_ra>
